<compile_context>
chip_gen: v7x
topology: tpu7x:2x2x1
jax: 0.10.0
libtpu: 0.0.40
codegen_flags: <defaults>
</compile_context>

<pallas_src>
import jax
import jax.numpy as jnp
import numpy as np
from jax import lax
from jax.experimental import pallas as pl
from jax.experimental.pallas import tpu as pltpu


def lstm_fused_kernel(ids_ref, emb_ref, wih_ref, b_ref, whh_ref, len_ref,
                      hout_ref, gx_ref):
    """Fused embedding + input projection + full LSTM recurrence.

    ids_ref : (T*B, 1) i32  -- token ids, time-major flattened
    emb_ref : (Vp, E)  f32  -- embedding table, vocab padded to multiple of 8
    wih_ref : (E, 4H)  f32  -- input weight, transposed, gate order [i,f,o,g]
    b_ref   : (1, 4H)  f32  -- b_ih + b_hh, gate order [i,f,o,g]
    whh_ref : (H, 4H)  bf16 -- recurrent weight, transposed, gate order [i,f,o,g]
    len_ref : (B, 1)   i32  -- valid sequence lengths
    hout_ref: (B, H)   f32  -- hidden state at each sequence's last valid step
    gx_ref  : (T*B, 4H) f32 -- VMEM scratch for the hoisted input projection
    """
    TB = ids_ref.shape[0]
    Vp, _ = emb_ref.shape
    B, H = hout_ref.shape
    T = TB // B

    # ---- off-serial-path prologue: embedding gather + input projection ------
    # Exact gather as a one-hot matmul (MXU-friendly; avoids dynamic gather).
    onehot = (ids_ref[...] ==
              lax.broadcasted_iota(jnp.int32, (TB, Vp), 1)).astype(jnp.float32)
    x = jnp.dot(onehot, emb_ref[...], preferred_element_type=jnp.float32)   # (TB, E)
    gx_ref[...] = (jnp.dot(x, wih_ref[...], preferred_element_type=jnp.float32)
                   + b_ref[...])                                            # (TB, 4H)

    lengths = len_ref[...]            # (B, 1) i32, loaded once
    whh = whh_ref[...]                # (H, 4H) bf16, loaded once (loop-invariant)

    def step(t, carry):
        h_prev, c_prev = carry        # each (B, H) f32
        off = pl.multiple_of(t * B, B)
        gx_t = gx_ref[pl.ds(off, B), :]                        # (B, 4H)
        # Only the recurrent matmul sits on the serial path; bf16 operands into
        # the MXU, f32 accumulation.
        gates = gx_t + jnp.dot(h_prev.astype(jnp.bfloat16), whh,
                               preferred_element_type=jnp.float32)
        # Gate order [i, f, o, g]: one contiguous sigmoid stream + one tanh.
        sig = jax.nn.sigmoid(gates[:, :3 * H])                 # (B, 3H)
        i_g = sig[:, 0 * H:1 * H]
        f_g = sig[:, 1 * H:2 * H]
        o_g = sig[:, 2 * H:3 * H]
        g_g = jnp.tanh(gates[:, 3 * H:])                       # (B, H)
        c_new = f_g * c_prev + i_g * g_g
        h_new = o_g * jnp.tanh(c_new)
        # pack_padded_sequence semantics: state freezes once t >= length[b], so
        # the carried h equals the hidden state at the last valid timestep.
        valid = t < lengths                                    # (B, 1) bool
        h = jnp.where(valid, h_new, h_prev)
        c = jnp.where(valid, c_new, c_prev)
        return (h, c)

    init = (jnp.zeros((B, H), jnp.float32), jnp.zeros((B, H), jnp.float32))
    h_last, _ = lax.fori_loop(0, T, step, init, unroll=True)
    hout_ref[...] = h_last                                     # lane-dense store


def vanilla_lstm_forward(kparams, input_ids, attention_mask):
    """Forward pass using kernel-ready params from make_kernel_params."""
    B, T = input_ids.shape
    H = kparams["w_hh_t"].shape[0]
    G = 4 * H
    Vp, E = kparams["embedding"].shape
    TB = T * B

    # Tiny host-side glue (int ops only): time-major token ids + lengths.
    ids_tm = input_ids.astype(jnp.int32).T.reshape(TB, 1)                 # (T*B, 1)
    lengths = jnp.sum(attention_mask, axis=1).astype(jnp.int32)[:, None]  # (B, 1)

    h_last = pl.pallas_call(
        lstm_fused_kernel,
        out_shape=jax.ShapeDtypeStruct((B, H), jnp.float32),
        grid=(1,),
        in_specs=[
            pl.BlockSpec((TB, 1), lambda i: (0, 0)),   # ids (time-major)
            pl.BlockSpec((Vp, E), lambda i: (0, 0)),   # embedding table
            pl.BlockSpec((E, G), lambda i: (0, 0)),    # W_ih^T   [i,f,o,g]
            pl.BlockSpec((1, G), lambda i: (0, 0)),    # b_ih+b_hh [i,f,o,g]
            pl.BlockSpec((H, G), lambda i: (0, 0)),    # W_hh^T (bf16) [i,f,o,g]
            pl.BlockSpec((B, 1), lambda i: (0, 0)),    # lengths
        ],
        out_specs=pl.BlockSpec((B, H), lambda i: (0, 0)),
        scratch_shapes=[pltpu.VMEM((TB, G), jnp.float32)],    # gates_x scratch
        compiler_params=pltpu.CompilerParams(
            dimension_semantics=("arbitrary",)),
    )(ids_tm, kparams["embedding"], kparams["w_ih_t"], kparams["b_gate"],
      kparams["w_hh_t"], lengths)

    # Final FC (H -> O=1) is lane-sparse; keep it in XLA outside the kernel.
    return h_last @ kparams["w_fc_t"] + kparams["b_fc"]


def make_kernel_params(params):
    """One-time host-side prep: gate reorder [i,f,g,o]->[i,f,o,g], vocab pad,
    bf16 cast of the recurrent weight."""
    H = params["w_hh_t"].shape[0]
    perm = np.concatenate([np.arange(0, 2 * H),          # i, f
                           np.arange(3 * H, 4 * H),      # o
                           np.arange(2 * H, 3 * H)])     # g
    emb = params["embedding"]
    V, E = emb.shape
    Vp = ((V + 7) // 8) * 8
    emb_pad = jnp.pad(emb, ((0, Vp - V), (0, 0)))
    return dict(
        embedding=emb_pad,                                   # (Vp, E) f32
        w_ih_t=params["w_ih_t"][:, perm],                    # (E, 4H) f32
        w_hh_t=params["w_hh_t"][:, perm].astype(jnp.bfloat16),  # (H, 4H) bf16
        b_gate=params["b_gate"][:, perm],                    # (1, 4H) f32
        w_fc_t=params["w_fc_t"],                             # (H, O)  f32
        b_fc=params["b_fc"],                                 # (1, O)  f32
    )


def reference_forward(params, input_ids, attention_mask,
                      recurrent_dtype=jnp.float32):
    """Pure-JAX lax.scan reference matching PyTorch packed-LSTM semantics
    (PyTorch gate order [i, f, g, o]). recurrent_dtype=bf16 mirrors the
    kernel's MXU operand precision for the recurrent matmul."""
    x = jnp.take(params["embedding"], input_ids, axis=0).astype(jnp.float32)
    B, T, _ = x.shape
    H = params["w_hh_t"].shape[0]
    gates_x = jnp.einsum("bte,eg->tbg", x, params["w_ih_t"]) + params["b_gate"]
    w_hh = params["w_hh_t"].astype(recurrent_dtype)
    lengths = jnp.sum(attention_mask, axis=1).astype(jnp.int32)
    step_valid = (jnp.arange(T)[:, None] < lengths[None, :]).astype(jnp.float32)

    def step(carry, inputs):
        h, c = carry
        gx_t, valid = inputs
        gates = gx_t + jnp.dot(h.astype(recurrent_dtype), w_hh,
                               preferred_element_type=jnp.float32)
        i_g = jax.nn.sigmoid(gates[:, :H])
        f_g = jax.nn.sigmoid(gates[:, H:2 * H])
        g_g = jnp.tanh(gates[:, 2 * H:3 * H])
        o_g = jax.nn.sigmoid(gates[:, 3 * H:])
        c_new = f_g * c + i_g * g_g
        h_new = o_g * jnp.tanh(c_new)
        v = valid[:, None]
        return (v * h_new + (1 - v) * h, v * c_new + (1 - v) * c), None

    (h, _), _ = lax.scan(
        step,
        (jnp.zeros((B, H), jnp.float32), jnp.zeros((B, H), jnp.float32)),
        (gates_x, step_valid))
    return h @ params["w_fc_t"] + params["b_fc"]


def init_params(key, vocab, embed_dim, hidden_dim, output_dim):
    """PyTorch-layout params (gate order [i, f, g, o]); used by the reference."""
    ks = jax.random.split(key, 7)
    scale = 1.0 / np.sqrt(hidden_dim)
    emb = jax.random.normal(ks[0], (vocab, embed_dim), jnp.float32)
    w_ih = jax.random.uniform(ks[1], (4 * hidden_dim, embed_dim), jnp.float32, -scale, scale)
    w_hh = jax.random.uniform(ks[2], (4 * hidden_dim, hidden_dim), jnp.float32, -scale, scale)
    b_ih = jax.random.uniform(ks[3], (4 * hidden_dim,), jnp.float32, -scale, scale)
    b_hh = jax.random.uniform(ks[4], (4 * hidden_dim,), jnp.float32, -scale, scale)
    w_fc = jax.random.uniform(ks[5], (output_dim, hidden_dim), jnp.float32, -scale, scale)
    b_fc = jax.random.uniform(ks[6], (output_dim,), jnp.float32, -scale, scale)
    return dict(
        embedding=emb,
        w_ih_t=w_ih.T,                      # (E, 4H)
        w_hh_t=w_hh.T,                      # (H, 4H)
        b_gate=(b_ih + b_hh)[None, :],      # (1, 4H)
        w_fc_t=w_fc.T,                      # (H, O)
        b_fc=b_fc[None, :],                 # (1, O)
    )


if __name__ == "__main__":
    VOCAB = 50
    EMBED_DIM = 32
    HIDDEN_DIM = 128   # matches module default
    OUTPUT_DIM = 1
    B, T = 8, 8

    key = jax.random.PRNGKey(0)
    k_params, k_ids = jax.random.split(key)
    params = init_params(k_params, VOCAB, EMBED_DIM, HIDDEN_DIM, OUTPUT_DIM)
    kparams = make_kernel_params(params)

    input_ids = jax.random.randint(k_ids, (B, T), 0, VOCAB, dtype=jnp.int32)
    lengths = jnp.array([8, 5, 3, 8, 1, 6, 7, 2], dtype=jnp.int32)
    attention_mask = (jnp.arange(T)[None, :] < lengths[:, None]).astype(jnp.int32)

    forward = jax.jit(vanilla_lstm_forward)
    out = jax.block_until_ready(forward(kparams, input_ids, attention_mask))

    # Check vs a reference using the same bf16 recurrent-matmul operands
    # (in-kernel f32 MXU input projection may differ from XLA by ~1e-4 scale).
    ref_bf16 = reference_forward(params, input_ids, attention_mask, jnp.bfloat16)
    np.testing.assert_allclose(np.asarray(out), np.asarray(ref_bf16),
                               rtol=5e-3, atol=5e-3)
    # Loose sanity check vs a full-fp32 reference (bf16 MXU operands only add
    # ~1e-3-scale error at these sizes).
    ref_f32 = reference_forward(params, input_ids, attention_mask, jnp.float32)
    np.testing.assert_allclose(np.asarray(out), np.asarray(ref_f32),
                               rtol=5e-2, atol=5e-2)

    print("KERNEL_OK")
</pallas_src>

<mosaic_0001>
module attributes {stable_mosaic.version = 11 : i64} {
  func.func @lstm_fused_kernel(%arg0: i32, %arg1: memref<64x1xi32, #tpu.memory_space<vmem>>, %arg2: memref<56x32xf32, #tpu.memory_space<vmem>>, %arg3: memref<32x512xf32, #tpu.memory_space<vmem>>, %arg4: memref<1x512xf32, #tpu.memory_space<vmem>>, %arg5: memref<128x512xbf16, #tpu.memory_space<vmem>>, %arg6: memref<8x1xi32, #tpu.memory_space<vmem>>, %arg7: memref<8x128xf32, #tpu.memory_space<vmem>>, %arg8: memref<64x512xf32, #tpu.memory_space<vmem>>) attributes {dimension_semantics = [#tpu.dimension_semantics<arbitrary>], iteration_bounds = array<i64: 1>, scalar_prefetch = 0 : i64, scratch_operands = 1 : i64, tpu.core_type = #tpu.core_type<tc>, window_params = [{pipeline_mode = #tpu.pipeline_mode<synchronous>, transform_indices = @transform_0, window_bounds = array<i64: 64, 1>}, {pipeline_mode = #tpu.pipeline_mode<synchronous>, transform_indices = @transform_1, window_bounds = array<i64: 56, 32>}, {pipeline_mode = #tpu.pipeline_mode<synchronous>, transform_indices = @transform_2, window_bounds = array<i64: 32, 512>}, {pipeline_mode = #tpu.pipeline_mode<synchronous>, transform_indices = @transform_3, window_bounds = array<i64: 1, 512>}, {pipeline_mode = #tpu.pipeline_mode<synchronous>, transform_indices = @transform_4, window_bounds = array<i64: 128, 512>}, {pipeline_mode = #tpu.pipeline_mode<synchronous>, transform_indices = @transform_5, window_bounds = array<i64: 8, 1>}, {pipeline_mode = #tpu.pipeline_mode<synchronous>, transform_indices = @transform_6, window_bounds = array<i64: 8, 128>}]} {
    %c0 = arith.constant 0 : index
    %c0_0 = arith.constant 0 : index
    %0 = vector.load %arg1[%c0, %c0_0] : memref<64x1xi32, #tpu.memory_space<vmem>>, vector<64x1xi32>
    %1 = tpu.iota {dimensions = array<i32: 1>} : vector<64x56xi32>
    %2 = vector.broadcast %0 : vector<64x1xi32> to vector<64x56xi32>
    %3 = arith.cmpi eq, %2, %1 : vector<64x56xi32>
    %4 = arith.extui %3 : vector<64x56xi1> to vector<64x56xi32>
    %5 = arith.sitofp %4 : vector<64x56xi32> to vector<64x56xf32>
    %c0_1 = arith.constant 0 : index
    %c0_2 = arith.constant 0 : index
    %6 = vector.load %arg2[%c0_1, %c0_2] : memref<56x32xf32, #tpu.memory_space<vmem>>, vector<56x32xf32>
    %cst = arith.constant dense<0.000000e+00> : vector<64x32xf32>
    %7 = tpu.matmul %5, %6, %cst {dimension_numbers = #tpu.dot_dimension_numbers<[1], [0], [0], [1], [0, 0, 1, 1], [], []>} : vector<64x56xf32>, vector<56x32xf32>, vector<64x32xf32> -> vector<64x32xf32>
    %c0_3 = arith.constant 0 : index
    %c0_4 = arith.constant 0 : index
    %8 = vector.load %arg3[%c0_3, %c0_4] : memref<32x512xf32, #tpu.memory_space<vmem>>, vector<32x512xf32>
    %cst_5 = arith.constant dense<0.000000e+00> : vector<64x512xf32>
    %9 = tpu.matmul %7, %8, %cst_5 {dimension_numbers = #tpu.dot_dimension_numbers<[1], [0], [0], [1], [0, 0, 1, 1], [], []>} : vector<64x32xf32>, vector<32x512xf32>, vector<64x512xf32> -> vector<64x512xf32>
    %c0_6 = arith.constant 0 : index
    %c0_7 = arith.constant 0 : index
    %10 = vector.load %arg4[%c0_6, %c0_7] : memref<1x512xf32, #tpu.memory_space<vmem>>, vector<1x512xf32>
    %11 = vector.broadcast %10 : vector<1x512xf32> to vector<64x512xf32>
    %12 = arith.addf %9, %11 : vector<64x512xf32>
    %c0_8 = arith.constant 0 : index
    %c0_9 = arith.constant 0 : index
    %13 = vector.load %arg8[%c0_8, %c0_9] : memref<64x512xf32, #tpu.memory_space<vmem>>, vector<64x512xf32>
    tpu.vector_store %arg8[%c0_8, %c0_9], %12 {strides = array<i32>} : memref<64x512xf32, #tpu.memory_space<vmem>>, vector<64x512xf32>,
    %c0_10 = arith.constant 0 : index
    %c0_11 = arith.constant 0 : index
    %14 = vector.load %arg6[%c0_10, %c0_11] : memref<8x1xi32, #tpu.memory_space<vmem>>, vector<8x1xi32>
    %c0_12 = arith.constant 0 : index
    %c0_13 = arith.constant 0 : index
    %15 = vector.load %arg5[%c0_12, %c0_13] : memref<128x512xbf16, #tpu.memory_space<vmem>>, vector<128x512xbf16>
    %cst_14 = arith.constant 0.000000e+00 : f32
    %16 = vector.broadcast %cst_14 : f32 to vector<8x128xf32>
    %cst_15 = arith.constant 0.000000e+00 : f32
    %17 = vector.broadcast %cst_15 : f32 to vector<8x128xf32>
    %c0_i32 = arith.constant 0 : i32
    %c8_i32 = arith.constant 8 : i32
    %18 = arith.muli %c0_i32, %c8_i32 : i32
    %19 = tpu.assume_multiple %18, 8 : i32
    %20 = arith.index_cast %19 : i32 to index
    %c0_16 = arith.constant 0 : index
    %21 = vector.load %arg8[%20, %c0_16] : memref<64x512xf32, #tpu.memory_space<vmem>>, vector<8x512xf32>
    %22 = arith.truncf %16 : vector<8x128xf32> to vector<8x128xbf16>
    %cst_17 = arith.constant dense<0.000000e+00> : vector<8x512xf32>
    %23 = tpu.matmul %22, %15, %cst_17 {dimension_numbers = #tpu.dot_dimension_numbers<[1], [0], [0], [1], [0, 0, 1, 1], [], []>} : vector<8x128xbf16>, vector<128x512xbf16>, vector<8x512xf32> -> vector<8x512xf32>
    %24 = arith.addf %21, %23 : vector<8x512xf32>
    %25 = vector.extract_strided_slice %24 {offsets = [0, 0], sizes = [8, 384], strides = [1, 1]} : vector<8x512xf32> to vector<8x384xf32>
    %26 = arith.negf %25 : vector<8x384xf32>
    %27 = math.exp %26 : vector<8x384xf32>
    %cst_18 = arith.constant 1.000000e+00 : f32
    %28 = vector.broadcast %cst_18 : f32 to vector<8x384xf32>
    %29 = arith.addf %28, %27 : vector<8x384xf32>
    %30 = arith.divf %28, %29 : vector<8x384xf32>
    %31 = vector.extract_strided_slice %30 {offsets = [0, 0], sizes = [8, 128], strides = [1, 1]} : vector<8x384xf32> to vector<8x128xf32>
    %32 = vector.extract_strided_slice %30 {offsets = [0, 128], sizes = [8, 128], strides = [1, 1]} : vector<8x384xf32> to vector<8x128xf32>
    %33 = vector.extract_strided_slice %30 {offsets = [0, 256], sizes = [8, 128], strides = [1, 1]} : vector<8x384xf32> to vector<8x128xf32>
    %34 = vector.extract_strided_slice %24 {offsets = [0, 384], sizes = [8, 128], strides = [1, 1]} : vector<8x512xf32> to vector<8x128xf32>
    %35 = math.tanh %34 : vector<8x128xf32>
    %36 = arith.mulf %32, %17 : vector<8x128xf32>
    %37 = arith.mulf %31, %35 : vector<8x128xf32>
    %38 = arith.addf %36, %37 : vector<8x128xf32>
    %39 = math.tanh %38 : vector<8x128xf32>
    %40 = arith.mulf %33, %39 : vector<8x128xf32>
    %41 = vector.broadcast %c0_i32 : i32 to vector<8x1xi32>
    %42 = arith.cmpi slt, %41, %14 : vector<8x1xi32>
    %43 = vector.shape_cast %42 : vector<8x1xi1> to vector<8x1xi1>
    %44 = vector.broadcast %43 : vector<8x1xi1> to vector<8x128xi1>
    %45 = arith.select %44, %40, %16 : vector<8x128xi1>, vector<8x128xf32>
    %46 = vector.shape_cast %42 : vector<8x1xi1> to vector<8x1xi1>
    %47 = vector.broadcast %46 : vector<8x1xi1> to vector<8x128xi1>
    %48 = arith.select %47, %38, %17 : vector<8x128xi1>, vector<8x128xf32>
    %c1_i32 = arith.constant 1 : i32
    %c8_i32_19 = arith.constant 8 : i32
    %49 = arith.muli %c1_i32, %c8_i32_19 : i32
    %50 = tpu.assume_multiple %49, 8 : i32
    %51 = arith.index_cast %50 : i32 to index
    %c0_20 = arith.constant 0 : index
    %52 = vector.load %arg8[%51, %c0_20] : memref<64x512xf32, #tpu.memory_space<vmem>>, vector<8x512xf32>
    %53 = arith.truncf %45 : vector<8x128xf32> to vector<8x128xbf16>
    %cst_21 = arith.constant dense<0.000000e+00> : vector<8x512xf32>
    %54 = tpu.matmul %53, %15, %cst_21 {dimension_numbers = #tpu.dot_dimension_numbers<[1], [0], [0], [1], [0, 0, 1, 1], [], []>} : vector<8x128xbf16>, vector<128x512xbf16>, vector<8x512xf32> -> vector<8x512xf32>
    %55 = arith.addf %52, %54 : vector<8x512xf32>
    %56 = vector.extract_strided_slice %55 {offsets = [0, 0], sizes = [8, 384], strides = [1, 1]} : vector<8x512xf32> to vector<8x384xf32>
    %57 = arith.negf %56 : vector<8x384xf32>
    %58 = math.exp %57 : vector<8x384xf32>
    %cst_22 = arith.constant 1.000000e+00 : f32
    %59 = vector.broadcast %cst_22 : f32 to vector<8x384xf32>
    %60 = arith.addf %59, %58 : vector<8x384xf32>
    %61 = arith.divf %59, %60 : vector<8x384xf32>
    %62 = vector.extract_strided_slice %61 {offsets = [0, 0], sizes = [8, 128], strides = [1, 1]} : vector<8x384xf32> to vector<8x128xf32>
    %63 = vector.extract_strided_slice %61 {offsets = [0, 128], sizes = [8, 128], strides = [1, 1]} : vector<8x384xf32> to vector<8x128xf32>
    %64 = vector.extract_strided_slice %61 {offsets = [0, 256], sizes = [8, 128], strides = [1, 1]} : vector<8x384xf32> to vector<8x128xf32>
    %65 = vector.extract_strided_slice %55 {offsets = [0, 384], sizes = [8, 128], strides = [1, 1]} : vector<8x512xf32> to vector<8x128xf32>
    %66 = math.tanh %65 : vector<8x128xf32>
    %67 = arith.mulf %63, %48 : vector<8x128xf32>
    %68 = arith.mulf %62, %66 : vector<8x128xf32>
    %69 = arith.addf %67, %68 : vector<8x128xf32>
    %70 = math.tanh %69 : vector<8x128xf32>
    %71 = arith.mulf %64, %70 : vector<8x128xf32>
    %72 = vector.broadcast %c1_i32 : i32 to vector<8x1xi32>
    %73 = arith.cmpi slt, %72, %14 : vector<8x1xi32>
    %74 = vector.shape_cast %73 : vector<8x1xi1> to vector<8x1xi1>
    %75 = vector.broadcast %74 : vector<8x1xi1> to vector<8x128xi1>
    %76 = arith.select %75, %71, %45 : vector<8x128xi1>, vector<8x128xf32>
    %77 = vector.shape_cast %73 : vector<8x1xi1> to vector<8x1xi1>
    %78 = vector.broadcast %77 : vector<8x1xi1> to vector<8x128xi1>
    %79 = arith.select %78, %69, %48 : vector<8x128xi1>, vector<8x128xf32>
    %c2_i32 = arith.constant 2 : i32
    %c8_i32_23 = arith.constant 8 : i32
    %80 = arith.muli %c2_i32, %c8_i32_23 : i32
    %81 = tpu.assume_multiple %80, 8 : i32
    %82 = arith.index_cast %81 : i32 to index
    %c0_24 = arith.constant 0 : index
    %83 = vector.load %arg8[%82, %c0_24] : memref<64x512xf32, #tpu.memory_space<vmem>>, vector<8x512xf32>
    %84 = arith.truncf %76 : vector<8x128xf32> to vector<8x128xbf16>
    %cst_25 = arith.constant dense<0.000000e+00> : vector<8x512xf32>
    %85 = tpu.matmul %84, %15, %cst_25 {dimension_numbers = #tpu.dot_dimension_numbers<[1], [0], [0], [1], [0, 0, 1, 1], [], []>} : vector<8x128xbf16>, vector<128x512xbf16>, vector<8x512xf32> -> vector<8x512xf32>
    %86 = arith.addf %83, %85 : vector<8x512xf32>
    %87 = vector.extract_strided_slice %86 {offsets = [0, 0], sizes = [8, 384], strides = [1, 1]} : vector<8x512xf32> to vector<8x384xf32>
    %88 = arith.negf %87 : vector<8x384xf32>
    %89 = math.exp %88 : vector<8x384xf32>
    %cst_26 = arith.constant 1.000000e+00 : f32
    %90 = vector.broadcast %cst_26 : f32 to vector<8x384xf32>
    %91 = arith.addf %90, %89 : vector<8x384xf32>
    %92 = arith.divf %90, %91 : vector<8x384xf32>
    %93 = vector.extract_strided_slice %92 {offsets = [0, 0], sizes = [8, 128], strides = [1, 1]} : vector<8x384xf32> to vector<8x128xf32>
    %94 = vector.extract_strided_slice %92 {offsets = [0, 128], sizes = [8, 128], strides = [1, 1]} : vector<8x384xf32> to vector<8x128xf32>
    %95 = vector.extract_strided_slice %92 {offsets = [0, 256], sizes = [8, 128], strides = [1, 1]} : vector<8x384xf32> to vector<8x128xf32>
    %96 = vector.extract_strided_slice %86 {offsets = [0, 384], sizes = [8, 128], strides = [1, 1]} : vector<8x512xf32> to vector<8x128xf32>
    %97 = math.tanh %96 : vector<8x128xf32>
    %98 = arith.mulf %94, %79 : vector<8x128xf32>
    %99 = arith.mulf %93, %97 : vector<8x128xf32>
    %100 = arith.addf %98, %99 : vector<8x128xf32>
    %101 = math.tanh %100 : vector<8x128xf32>
    %102 = arith.mulf %95, %101 : vector<8x128xf32>
    %103 = vector.broadcast %c2_i32 : i32 to vector<8x1xi32>
    %104 = arith.cmpi slt, %103, %14 : vector<8x1xi32>
    %105 = vector.shape_cast %104 : vector<8x1xi1> to vector<8x1xi1>
    %106 = vector.broadcast %105 : vector<8x1xi1> to vector<8x128xi1>
    %107 = arith.select %106, %102, %76 : vector<8x128xi1>, vector<8x128xf32>
    %108 = vector.shape_cast %104 : vector<8x1xi1> to vector<8x1xi1>
    %109 = vector.broadcast %108 : vector<8x1xi1> to vector<8x128xi1>
    %110 = arith.select %109, %100, %79 : vector<8x128xi1>, vector<8x128xf32>
    %c3_i32 = arith.constant 3 : i32
    %c8_i32_27 = arith.constant 8 : i32
    %111 = arith.muli %c3_i32, %c8_i32_27 : i32
    %112 = tpu.assume_multiple %111, 8 : i32
    %113 = arith.index_cast %112 : i32 to index
    %c0_28 = arith.constant 0 : index
    %114 = vector.load %arg8[%113, %c0_28] : memref<64x512xf32, #tpu.memory_space<vmem>>, vector<8x512xf32>
    %115 = arith.truncf %107 : vector<8x128xf32> to vector<8x128xbf16>
    %cst_29 = arith.constant dense<0.000000e+00> : vector<8x512xf32>
    %116 = tpu.matmul %115, %15, %cst_29 {dimension_numbers = #tpu.dot_dimension_numbers<[1], [0], [0], [1], [0, 0, 1, 1], [], []>} : vector<8x128xbf16>, vector<128x512xbf16>, vector<8x512xf32> -> vector<8x512xf32>
    %117 = arith.addf %114, %116 : vector<8x512xf32>
    %118 = vector.extract_strided_slice %117 {offsets = [0, 0], sizes = [8, 384], strides = [1, 1]} : vector<8x512xf32> to vector<8x384xf32>
    %119 = arith.negf %118 : vector<8x384xf32>
    %120 = math.exp %119 : vector<8x384xf32>
    %cst_30 = arith.constant 1.000000e+00 : f32
    %121 = vector.broadcast %cst_30 : f32 to vector<8x384xf32>
    %122 = arith.addf %121, %120 : vector<8x384xf32>
    %123 = arith.divf %121, %122 : vector<8x384xf32>
    %124 = vector.extract_strided_slice %123 {offsets = [0, 0], sizes = [8, 128], strides = [1, 1]} : vector<8x384xf32> to vector<8x128xf32>
    %125 = vector.extract_strided_slice %123 {offsets = [0, 128], sizes = [8, 128], strides = [1, 1]} : vector<8x384xf32> to vector<8x128xf32>
    %126 = vector.extract_strided_slice %123 {offsets = [0, 256], sizes = [8, 128], strides = [1, 1]} : vector<8x384xf32> to vector<8x128xf32>
    %127 = vector.extract_strided_slice %117 {offsets = [0, 384], sizes = [8, 128], strides = [1, 1]} : vector<8x512xf32> to vector<8x128xf32>
    %128 = math.tanh %127 : vector<8x128xf32>
    %129 = arith.mulf %125, %110 : vector<8x128xf32>
    %130 = arith.mulf %124, %128 : vector<8x128xf32>
    %131 = arith.addf %129, %130 : vector<8x128xf32>
    %132 = math.tanh %131 : vector<8x128xf32>
    %133 = arith.mulf %126, %132 : vector<8x128xf32>
    %134 = vector.broadcast %c3_i32 : i32 to vector<8x1xi32>
    %135 = arith.cmpi slt, %134, %14 : vector<8x1xi32>
    %136 = vector.shape_cast %135 : vector<8x1xi1> to vector<8x1xi1>
    %137 = vector.broadcast %136 : vector<8x1xi1> to vector<8x128xi1>
    %138 = arith.select %137, %133, %107 : vector<8x128xi1>, vector<8x128xf32>
    %139 = vector.shape_cast %135 : vector<8x1xi1> to vector<8x1xi1>
    %140 = vector.broadcast %139 : vector<8x1xi1> to vector<8x128xi1>
    %141 = arith.select %140, %131, %110 : vector<8x128xi1>, vector<8x128xf32>
    %c4_i32 = arith.constant 4 : i32
    %c8_i32_31 = arith.constant 8 : i32
    %142 = arith.muli %c4_i32, %c8_i32_31 : i32
    %143 = tpu.assume_multiple %142, 8 : i32
    %144 = arith.index_cast %143 : i32 to index
    %c0_32 = arith.constant 0 : index
    %145 = vector.load %arg8[%144, %c0_32] : memref<64x512xf32, #tpu.memory_space<vmem>>, vector<8x512xf32>
    %146 = arith.truncf %138 : vector<8x128xf32> to vector<8x128xbf16>
    %cst_33 = arith.constant dense<0.000000e+00> : vector<8x512xf32>
    %147 = tpu.matmul %146, %15, %cst_33 {dimension_numbers = #tpu.dot_dimension_numbers<[1], [0], [0], [1], [0, 0, 1, 1], [], []>} : vector<8x128xbf16>, vector<128x512xbf16>, vector<8x512xf32> -> vector<8x512xf32>
    %148 = arith.addf %145, %147 : vector<8x512xf32>
    %149 = vector.extract_strided_slice %148 {offsets = [0, 0], sizes = [8, 384], strides = [1, 1]} : vector<8x512xf32> to vector<8x384xf32>
    %150 = arith.negf %149 : vector<8x384xf32>
    %151 = math.exp %150 : vector<8x384xf32>
    %cst_34 = arith.constant 1.000000e+00 : f32
    %152 = vector.broadcast %cst_34 : f32 to vector<8x384xf32>
    %153 = arith.addf %152, %151 : vector<8x384xf32>
    %154 = arith.divf %152, %153 : vector<8x384xf32>
    %155 = vector.extract_strided_slice %154 {offsets = [0, 0], sizes = [8, 128], strides = [1, 1]} : vector<8x384xf32> to vector<8x128xf32>
    %156 = vector.extract_strided_slice %154 {offsets = [0, 128], sizes = [8, 128], strides = [1, 1]} : vector<8x384xf32> to vector<8x128xf32>
    %157 = vector.extract_strided_slice %154 {offsets = [0, 256], sizes = [8, 128], strides = [1, 1]} : vector<8x384xf32> to vector<8x128xf32>
    %158 = vector.extract_strided_slice %148 {offsets = [0, 384], sizes = [8, 128], strides = [1, 1]} : vector<8x512xf32> to vector<8x128xf32>
    %159 = math.tanh %158 : vector<8x128xf32>
    %160 = arith.mulf %156, %141 : vector<8x128xf32>
    %161 = arith.mulf %155, %159 : vector<8x128xf32>
    %162 = arith.addf %160, %161 : vector<8x128xf32>
    %163 = math.tanh %162 : vector<8x128xf32>
    %164 = arith.mulf %157, %163 : vector<8x128xf32>
    %165 = vector.broadcast %c4_i32 : i32 to vector<8x1xi32>
    %166 = arith.cmpi slt, %165, %14 : vector<8x1xi32>
    %167 = vector.shape_cast %166 : vector<8x1xi1> to vector<8x1xi1>
    %168 = vector.broadcast %167 : vector<8x1xi1> to vector<8x128xi1>
    %169 = arith.select %168, %164, %138 : vector<8x128xi1>, vector<8x128xf32>
    %170 = vector.shape_cast %166 : vector<8x1xi1> to vector<8x1xi1>
    %171 = vector.broadcast %170 : vector<8x1xi1> to vector<8x128xi1>
    %172 = arith.select %171, %162, %141 : vector<8x128xi1>, vector<8x128xf32>
    %c5_i32 = arith.constant 5 : i32
    %c8_i32_35 = arith.constant 8 : i32
    %173 = arith.muli %c5_i32, %c8_i32_35 : i32
    %174 = tpu.assume_multiple %173, 8 : i32
    %175 = arith.index_cast %174 : i32 to index
    %c0_36 = arith.constant 0 : index
    %176 = vector.load %arg8[%175, %c0_36] : memref<64x512xf32, #tpu.memory_space<vmem>>, vector<8x512xf32>
    %177 = arith.truncf %169 : vector<8x128xf32> to vector<8x128xbf16>
    %cst_37 = arith.constant dense<0.000000e+00> : vector<8x512xf32>
    %178 = tpu.matmul %177, %15, %cst_37 {dimension_numbers = #tpu.dot_dimension_numbers<[1], [0], [0], [1], [0, 0, 1, 1], [], []>} : vector<8x128xbf16>, vector<128x512xbf16>, vector<8x512xf32> -> vector<8x512xf32>
    %179 = arith.addf %176, %178 : vector<8x512xf32>
    %180 = vector.extract_strided_slice %179 {offsets = [0, 0], sizes = [8, 384], strides = [1, 1]} : vector<8x512xf32> to vector<8x384xf32>
    %181 = arith.negf %180 : vector<8x384xf32>
    %182 = math.exp %181 : vector<8x384xf32>
    %cst_38 = arith.constant 1.000000e+00 : f32
    %183 = vector.broadcast %cst_38 : f32 to vector<8x384xf32>
    %184 = arith.addf %183, %182 : vector<8x384xf32>
    %185 = arith.divf %183, %184 : vector<8x384xf32>
    %186 = vector.extract_strided_slice %185 {offsets = [0, 0], sizes = [8, 128], strides = [1, 1]} : vector<8x384xf32> to vector<8x128xf32>
    %187 = vector.extract_strided_slice %185 {offsets = [0, 128], sizes = [8, 128], strides = [1, 1]} : vector<8x384xf32> to vector<8x128xf32>
    %188 = vector.extract_strided_slice %185 {offsets = [0, 256], sizes = [8, 128], strides = [1, 1]} : vector<8x384xf32> to vector<8x128xf32>
    %189 = vector.extract_strided_slice %179 {offsets = [0, 384], sizes = [8, 128], strides = [1, 1]} : vector<8x512xf32> to vector<8x128xf32>
    %190 = math.tanh %189 : vector<8x128xf32>
    %191 = arith.mulf %187, %172 : vector<8x128xf32>
    %192 = arith.mulf %186, %190 : vector<8x128xf32>
    %193 = arith.addf %191, %192 : vector<8x128xf32>
    %194 = math.tanh %193 : vector<8x128xf32>
    %195 = arith.mulf %188, %194 : vector<8x128xf32>
    %196 = vector.broadcast %c5_i32 : i32 to vector<8x1xi32>
    %197 = arith.cmpi slt, %196, %14 : vector<8x1xi32>
    %198 = vector.shape_cast %197 : vector<8x1xi1> to vector<8x1xi1>
    %199 = vector.broadcast %198 : vector<8x1xi1> to vector<8x128xi1>
    %200 = arith.select %199, %195, %169 : vector<8x128xi1>, vector<8x128xf32>
    %201 = vector.shape_cast %197 : vector<8x1xi1> to vector<8x1xi1>
    %202 = vector.broadcast %201 : vector<8x1xi1> to vector<8x128xi1>
    %203 = arith.select %202, %193, %172 : vector<8x128xi1>, vector<8x128xf32>
    %c6_i32 = arith.constant 6 : i32
    %c8_i32_39 = arith.constant 8 : i32
    %204 = arith.muli %c6_i32, %c8_i32_39 : i32
    %205 = tpu.assume_multiple %204, 8 : i32
    %206 = arith.index_cast %205 : i32 to index
    %c0_40 = arith.constant 0 : index
    %207 = vector.load %arg8[%206, %c0_40] : memref<64x512xf32, #tpu.memory_space<vmem>>, vector<8x512xf32>
    %208 = arith.truncf %200 : vector<8x128xf32> to vector<8x128xbf16>
    %cst_41 = arith.constant dense<0.000000e+00> : vector<8x512xf32>
    %209 = tpu.matmul %208, %15, %cst_41 {dimension_numbers = #tpu.dot_dimension_numbers<[1], [0], [0], [1], [0, 0, 1, 1], [], []>} : vector<8x128xbf16>, vector<128x512xbf16>, vector<8x512xf32> -> vector<8x512xf32>
    %210 = arith.addf %207, %209 : vector<8x512xf32>
    %211 = vector.extract_strided_slice %210 {offsets = [0, 0], sizes = [8, 384], strides = [1, 1]} : vector<8x512xf32> to vector<8x384xf32>
    %212 = arith.negf %211 : vector<8x384xf32>
    %213 = math.exp %212 : vector<8x384xf32>
    %cst_42 = arith.constant 1.000000e+00 : f32
    %214 = vector.broadcast %cst_42 : f32 to vector<8x384xf32>
    %215 = arith.addf %214, %213 : vector<8x384xf32>
    %216 = arith.divf %214, %215 : vector<8x384xf32>
    %217 = vector.extract_strided_slice %216 {offsets = [0, 0], sizes = [8, 128], strides = [1, 1]} : vector<8x384xf32> to vector<8x128xf32>
    %218 = vector.extract_strided_slice %216 {offsets = [0, 128], sizes = [8, 128], strides = [1, 1]} : vector<8x384xf32> to vector<8x128xf32>
    %219 = vector.extract_strided_slice %216 {offsets = [0, 256], sizes = [8, 128], strides = [1, 1]} : vector<8x384xf32> to vector<8x128xf32>
    %220 = vector.extract_strided_slice %210 {offsets = [0, 384], sizes = [8, 128], strides = [1, 1]} : vector<8x512xf32> to vector<8x128xf32>
    %221 = math.tanh %220 : vector<8x128xf32>
    %222 = arith.mulf %218, %203 : vector<8x128xf32>
    %223 = arith.mulf %217, %221 : vector<8x128xf32>
    %224 = arith.addf %222, %223 : vector<8x128xf32>
    %225 = math.tanh %224 : vector<8x128xf32>
    %226 = arith.mulf %219, %225 : vector<8x128xf32>
    %227 = vector.broadcast %c6_i32 : i32 to vector<8x1xi32>
    %228 = arith.cmpi slt, %227, %14 : vector<8x1xi32>
    %229 = vector.shape_cast %228 : vector<8x1xi1> to vector<8x1xi1>
    %230 = vector.broadcast %229 : vector<8x1xi1> to vector<8x128xi1>
    %231 = arith.select %230, %226, %200 : vector<8x128xi1>, vector<8x128xf32>
    %232 = vector.shape_cast %228 : vector<8x1xi1> to vector<8x1xi1>
    %233 = vector.broadcast %232 : vector<8x1xi1> to vector<8x128xi1>
    %234 = arith.select %233, %224, %203 : vector<8x128xi1>, vector<8x128xf32>
    %c7_i32 = arith.constant 7 : i32
    %c8_i32_43 = arith.constant 8 : i32
    %235 = arith.muli %c7_i32, %c8_i32_43 : i32
    %236 = tpu.assume_multiple %235, 8 : i32
    %237 = arith.index_cast %236 : i32 to index
    %c0_44 = arith.constant 0 : index
    %238 = vector.load %arg8[%237, %c0_44] : memref<64x512xf32, #tpu.memory_space<vmem>>, vector<8x512xf32>
    %239 = arith.truncf %231 : vector<8x128xf32> to vector<8x128xbf16>
    %cst_45 = arith.constant dense<0.000000e+00> : vector<8x512xf32>
    %240 = tpu.matmul %239, %15, %cst_45 {dimension_numbers = #tpu.dot_dimension_numbers<[1], [0], [0], [1], [0, 0, 1, 1], [], []>} : vector<8x128xbf16>, vector<128x512xbf16>, vector<8x512xf32> -> vector<8x512xf32>
    %241 = arith.addf %238, %240 : vector<8x512xf32>
    %242 = vector.extract_strided_slice %241 {offsets = [0, 0], sizes = [8, 384], strides = [1, 1]} : vector<8x512xf32> to vector<8x384xf32>
    %243 = arith.negf %242 : vector<8x384xf32>
    %244 = math.exp %243 : vector<8x384xf32>
    %cst_46 = arith.constant 1.000000e+00 : f32
    %245 = vector.broadcast %cst_46 : f32 to vector<8x384xf32>
    %246 = arith.addf %245, %244 : vector<8x384xf32>
    %247 = arith.divf %245, %246 : vector<8x384xf32>
    %248 = vector.extract_strided_slice %247 {offsets = [0, 0], sizes = [8, 128], strides = [1, 1]} : vector<8x384xf32> to vector<8x128xf32>
    %249 = vector.extract_strided_slice %247 {offsets = [0, 128], sizes = [8, 128], strides = [1, 1]} : vector<8x384xf32> to vector<8x128xf32>
    %250 = vector.extract_strided_slice %247 {offsets = [0, 256], sizes = [8, 128], strides = [1, 1]} : vector<8x384xf32> to vector<8x128xf32>
    %251 = vector.extract_strided_slice %241 {offsets = [0, 384], sizes = [8, 128], strides = [1, 1]} : vector<8x512xf32> to vector<8x128xf32>
    %252 = math.tanh %251 : vector<8x128xf32>
    %253 = arith.mulf %249, %234 : vector<8x128xf32>
    %254 = arith.mulf %248, %252 : vector<8x128xf32>
    %255 = arith.addf %253, %254 : vector<8x128xf32>
    %256 = math.tanh %255 : vector<8x128xf32>
    %257 = arith.mulf %250, %256 : vector<8x128xf32>
    %258 = vector.broadcast %c7_i32 : i32 to vector<8x1xi32>
    %259 = arith.cmpi slt, %258, %14 : vector<8x1xi32>
    %260 = vector.shape_cast %259 : vector<8x1xi1> to vector<8x1xi1>
    %261 = vector.broadcast %260 : vector<8x1xi1> to vector<8x128xi1>
    %262 = arith.select %261, %257, %231 : vector<8x128xi1>, vector<8x128xf32>
    %263 = vector.shape_cast %259 : vector<8x1xi1> to vector<8x1xi1>
    %264 = vector.broadcast %263 : vector<8x1xi1> to vector<8x128xi1>
    %265 = arith.select %264, %255, %234 : vector<8x128xi1>, vector<8x128xf32>
    %c8_i32_47 = arith.constant 8 : i32
    %c0_48 = arith.constant 0 : index
    %c0_49 = arith.constant 0 : index
    %266 = vector.load %arg7[%c0_48, %c0_49] : memref<8x128xf32, #tpu.memory_space<vmem>>, vector<8x128xf32>
    tpu.vector_store %arg7[%c0_48, %c0_49], %262 {strides = array<i32>} : memref<8x128xf32, #tpu.memory_space<vmem>>, vector<8x128xf32>,
    return
  }
  func.func @transform_0(%arg0: i32) -> (i32, i32) {
    %c0_i32 = arith.constant 0 : i32
    %c0_i32_0 = arith.constant 0 : i32
    %c0_i32_1 = arith.constant 0 : i32
    return %c0_i32, %c0_i32_0 : i32, i32
  }
  func.func @transform_1(%arg0: i32) -> (i32, i32) {
    %c0_i32 = arith.constant 0 : i32
    %c0_i32_0 = arith.constant 0 : i32
    %c0_i32_1 = arith.constant 0 : i32
    return %c0_i32, %c0_i32_0 : i32, i32
  }
  func.func @transform_2(%arg0: i32) -> (i32, i32) {
    %c0_i32 = arith.constant 0 : i32
    %c0_i32_0 = arith.constant 0 : i32
    %c0_i32_1 = arith.constant 0 : i32
    return %c0_i32, %c0_i32_0 : i32, i32
  }
  func.func @transform_3(%arg0: i32) -> (i32, i32) {
    %c0_i32 = arith.constant 0 : i32
    %c0_i32_0 = arith.constant 0 : i32
    %c0_i32_1 = arith.constant 0 : i32
    return %c0_i32, %c0_i32_0 : i32, i32
  }
  func.func @transform_4(%arg0: i32) -> (i32, i32) {
    %c0_i32 = arith.constant 0 : i32
    %c0_i32_0 = arith.constant 0 : i32
    %c0_i32_1 = arith.constant 0 : i32
    return %c0_i32, %c0_i32_0 : i32, i32
  }
  func.func @transform_5(%arg0: i32) -> (i32, i32) {
    %c0_i32 = arith.constant 0 : i32
    %c0_i32_0 = arith.constant 0 : i32
    %c0_i32_1 = arith.constant 0 : i32
    return %c0_i32, %c0_i32_0 : i32, i32
  }
  func.func @transform_6(%arg0: i32) -> (i32, i32) {
    %c0_i32 = arith.constant 0 : i32
    %c0_i32_0 = arith.constant 0 : i32
    %c0_i32_1 = arith.constant 0 : i32
    return %c0_i32, %c0_i32_0 : i32, i32
  }
}

</mosaic_0001>

<bundles_post_ra>
// kernel: vanilla_lstm_forward.1
= control target key start
LH: loop header
LB: loop body
LE: loop exit
PB: predicated region body
PF: predicated region fallthrough
CT: control target
= control target key end

     0   :  { %11 = vsyncpa [#allocation4], 0  ;;  %s2176_s21 = smov [#allocation3]   ;;  %s2976_s0 = inlined_call_operand.vmem [shape: s32[64,1], index: 0, kind: input, shape index: {}]   ;;  %s2977_s1 = inlined_call_operand.vmem [shape: f32[56,32], index: 1, kind: input, shape index: {}]   ;;  %s2978_s2 = inlined_call_operand.vmem [shape: f32[32,512], index: 2, kind: input, shape index: {}]   ;;  %s2979_s3 = inlined_call_operand.vmem [shape: f32[1,512], index: 3, kind: input, shape index: {}]   ;;  %s2980_s4 = inlined_call_operand.hbm [shape: bf16[128,512], index: 4, kind: input, shape index: {}]   ;;  %s2981_s5 = inlined_call_operand.vmem [shape: s32[8,1], index: 5, kind: input, shape index: {}]   ;;  %s2982_s6 = inlined_call_operand.vmem [shape: f32[8,128], index: 6, kind: output, shape index: {}]  }
   0x1   :  { %s25_s22 = sshll.u32 %s2176_s21, 4  ;;  %s2152_s25 = scalar_lea.hbm %s2980_s4, 4096  ;;  %s26_s22 = int_to_ptr.vmem [resolvable:$true] %s25_s22 }
   0x2   :  { %p2153_p0 = scmp.ne.s32.totalorder %s2980_s4, %s2152_s25  ;;  %p2156_p1 = scmp.lt.u32.totalorder %s2152_s25, %s2980_s4 }
   0x4   :  { %p2158_p2 = pnand %p2156_p1, %p2153_p0 }
   0x6   :  { %2161 = shalt.err (!%p2158_p2)
}
   0x7   :  { %s2162_s30 = scalar_lea.vmem %s26_s22, 4096  ;;  %p2167_p4 = scmp.lt.s32.totalorder %s26_s22, %s26_s22 }
   0x8   :  { %p2163_p3 = scmp.ne.s32.totalorder %s26_s22, %s2162_s30  ;;  %p2168_p5 = scmp.lt.s32.totalorder %s2162_s30, %s2162_s30 }
   0xa   :  { %p2169_p6 = por %p2168_p5, %p2167_p4 }
   0xc   :  { %p2170_p7 = pnand %p2169_p6, %p2163_p3 }
   0xe   :  { %2173 = shalt.err (!%p2170_p7)
}
   0xf   :  { %s2177_s7 = smov 256   ;;  %s2178_s8 = smov 16  }
  0x10   :  { %31 = dma.hbm_to_vmem [thread:$0]  %s2980_s4, 4096, %s26_s22, [#allocation4], %s2177_s7, %s2177_s7, %s2178_s8  }
  0x11   :  { %2174 = dma.done.wait [#allocation4], 4096  }
  0x12   :  { %2175 = vsyncadd [#allocation4], 4294963200  ;;  %v2983_v0 = vmov 0   ;;  %v40_v1 = vld [vmem:[%s2976_s0 + $0x10] sm:$0xff]  ;;  %v38_v2 = vld [vmem:[%s2976_s0] sm:$0xff]  ;;  %v46_v34 = vlaneseq  ;;  %vm103_vm8 = vcmask 457728  }
  0x13   :  { %1943 = vset.pattern.permute.xlu1 %v2983_v0  ;;  %1942 = vset.pattern.permute.xlu0 %v2983_v0  ;;  %v41_v3 = vld [vmem:[%s2976_s0 + $0x18] sm:$0xff]  ;;  %v39_v4 = vld [vmem:[%s2976_s0 + $0x8] sm:$0xff]  ;;  %v96_v5 = vld [vmem:[%s2977_s1] sm:$0xff]  ;;  %v2180_v40 = vmov 0.0  }
  0x14   :  { %55 = vperm.xlu1 %1943, %v40_v1   ;;  %49 = vperm.xlu0 %1942, %v38_v2   ;;  %v97_v6 = vld [vmem:[%s2977_s1 + $0x8] sm:$0xff]  ;;  %v98_v8 = vld [vmem:[%s2977_s1 + $0x10] sm:$0xff]  ;;  %v99_v9 = vld [vmem:[%s2977_s1 + $0x18] sm:$0xff]  ;;  %v47_v35 = vand.u32 127, %v46_v34 }
  0x15   :  { %v43_v7 = vld [vmem:[%s2976_s0 + $0x28] sm:$0xff]  ;;  %v42_v10 = vld [vmem:[%s2976_s0 + $0x20] sm:$0xff]  ;;  %v1901_v12 = vpack.c.bf16 %v97_v6, %v96_v5  ;;  %v45_v15 = vld [vmem:[%s2976_s0 + $0x38] sm:$0xff]  ;;  %v1905_v17 = vpack.c.bf16 %v99_v9, %v98_v8 }
  0x16   :  { %v554_v11 = vld [vmem:[%s2981_s5] sm:$0xff]  ;;  %v101_v14 = vld [vmem:[%s2977_s1 + $0x28] sm:$0xff]  ;;  %v44_v16 = vld [vmem:[%s2976_s0 + $0x30] sm:$0xff] }
  0x17   :  { %v100_v13 = vld [vmem:[%s2977_s1 + $0x20] sm:$0xff]  ;;  %1902 = vmatprep.subr.bf16.mxu0 %v1901_v12  ;;  %1929 = vmatprep.subr.bf16.mxu1 %v1901_v12  ;;  %vm990_vm0 = vcmp.gt.s32.totalorder %v554_v11, 1  ;;  %vm864_vm1 = vcmp.gt.s32.totalorder %v554_v11, 0  ;;  %vm1242_vm2 = vcmp.gt.s32.totalorder %v554_v11, 3  ;;  %vm1116_vm3 = vcmp.gt.s32.totalorder %v554_v11, 2  ;;  %v102_v21 = vld [vmem:[%s2977_s1 + $0x30] sm:$0xff] }
  0x18   :  { %58 = vperm.xlu1 %1943, %v41_v3   ;;  %52 = vperm.xlu0 %1942, %v39_v4   ;;  %v1909_v18 = vpack.c.bf16 %v101_v14, %v100_v13  ;;  %v991_v19 = vsel %vm990_vm0, 1, %v2983_v0  ;;  %v865_v20 = vsel %vm864_vm1, 1, %v2983_v0  ;;  %v1243_v22 = vsel %vm1242_vm2, 1, %v2983_v0  ;;  %v234_v28 = vld [vmem:[%s2978_s2 + $0x8] sm:$0xff]  ;;  %v236_v31 = vld [vmem:[%s2978_s2 + $0x18] sm:$0xff]  ;;  %v235_v38 = vld [vmem:[%s2978_s2 + $0x10] sm:$0xff] }
  0x19   :  { %1904 = vmatpush3.bf16.msra.mxu0 %v1901_v12  ;;  %1933 = vmatpush3.bf16.msra.mxu1 %v1901_v12  ;;  %v1117_v23 = vsel %vm1116_vm3, 1, %v2983_v0  ;;  %vm1494_vm4 = vcmp.gt.s32.totalorder %v554_v11, 5  ;;  %vm1368_vm5 = vcmp.gt.s32.totalorder %v554_v11, 4  ;;  %vm1746_vm6 = vcmp.gt.s32.totalorder %v554_v11, 7  ;;  %v238_v29 = vld [vmem:[%s2978_s2 + $0x28] sm:$0xff]  ;;  %v240_v32 = vld [vmem:[%s2978_s2 + $0x38] sm:$0xff] }
  0x1a   :  { %1906 = vmatprep.subr.bf16.mxu0 %v1905_v17  ;;  %1930 = vmatprep.subr.bf16.mxu1 %v1905_v17  ;;  %v1495_v24 = vsel %vm1494_vm4, 1, %v2983_v0  ;;  %v1369_v25 = vsel %vm1368_vm5, 1, %v2983_v0  ;;  %vm1620_vm7 = vcmp.gt.s32.totalorder %v554_v11, 6  ;;  %v1747_v26 = vsel %vm1746_vm6, 1, %v2983_v0  ;;  %v239_v39 = vld [vmem:[%s2978_s2 + $0x30] sm:$0xff]  ;;  %v244_v42 = vld [vmem:[%s2978_s2 + $0x58] sm:$0xff] }
  0x1b   :  { %v1621_v27 = vsel %vm1620_vm7, 1, %v2983_v0  ;;  %v1913_v30 = vpack.c.bf16 %v238_v29, %v234_v28  ;;  %v1921_v33 = vpack.c.bf16 %v240_v32, %v236_v31  ;;  %v248_v43 = vld [vmem:[%s2978_s2 + $0x78] sm:$0xff]  ;;  %v1923_v46 = vpack.c.bf16 %v239_v39, %v235_v38  ;;  %v243_v49 = vld [vmem:[%s2978_s2 + $0x50] sm:$0xff]  ;;  %v233_v52 = vld [vmem:[%s2978_s2] sm:$0xff] }
  0x1c   :  { %64 = vperm.xlu1 %1943, %v43_v7   ;;  %61 = vperm.xlu0 %1942, %v42_v10   ;;  %v1925_v48 = vpack.c.bf16 %v248_v43, %v244_v42  ;;  %v247_v50 = vld [vmem:[%s2978_s2 + $0x70] sm:$0xff]  ;;  %v237_v53 = vld [vmem:[%s2978_s2 + $0x20] sm:$0xff]  ;;  %v242_v54 = vld [vmem:[%s2978_s2 + $0x48] sm:$0xff]  ;;  %vm271_vm1 = vcmask 261120  }
  0x1d   :  { %1908 = vmatpush3.bf16.msra.mxu0 %v1905_v17  ;;  %1934 = vmatpush3.bf16.msra.mxu1 %v1905_v17  ;;  %v246_v55 = vld [vmem:[%s2978_s2 + $0x68] sm:$0xff]  ;;  %v1927_v59 = vpack.c.bf16 %v247_v50, %v243_v49  ;;  %v1915_v60 = vpack.c.bf16 %v237_v53, %v233_v52  ;;  %v241_v1 = vld [vmem:[%s2978_s2 + $0x40] sm:$0xff] }
  0x1e   :  { %1910 = vmatprep.subr.bf16.mxu0 %v1909_v18  ;;  %1931 = vmatprep.subr.bf16.mxu1 %v1909_v18  ;;  %v1917_v63 = vpack.c.bf16 %v246_v55, %v242_v54  ;;  %v245_v2 = vld [vmem:[%s2978_s2 + $0x60] sm:$0xff]  ;;  %v2355_v9 = vld [vmem:[#allocation3 + $0xc] ss:$16 sps:$4 sm:$0xff]   ;;  %v2361_v11 = vld [vmem:[#allocation3 + $0x8] ss:$16 sps:$4 sm:$0xff]  }
  0x1f   :  { %v1919_v5 = vpack.c.bf16 %v245_v2, %v241_v1  ;;  %v2353_v8 = vld [vmem:[#allocation3 + $0x4] ss:$16 sps:$4 sm:$0xff]   ;;  %v2359_v10 = vld [vmem:[#allocation3] ss:$16 sps:$4 sm:$0xff]   ;;  %v2373_v17 = vld [vmem:[#allocation3 + $0x28] ss:$16 sps:$4 sm:$0xff]  }
  0x20   :  { %70 = vperm.xlu1 %1943, %v45_v15   ;;  %67 = vperm.xlu0 %1942, %v44_v16   ;;  %v2363_v14 = vld [vmem:[#allocation3 + $0x24] ss:$16 sps:$4 sm:$0xff]   ;;  %v2365_v15 = vld [vmem:[#allocation3 + $0x2c] ss:$16 sps:$4 sm:$0xff]   ;;  %v2371_v16 = vld [vmem:[#allocation3 + $0x20] ss:$16 sps:$4 sm:$0xff]  }
  0x21   :  { %1912 = vmatpush3.bf16.msra.mxu0 %v1909_v18  ;;  %1935 = vmatpush3.bf16.msra.mxu1 %v1909_v18  ;;  %v2399_v28 = vld [vmem:[#allocation3 + $0x6c] ss:$16 sps:$4 sm:$0xff]   ;;  %v2407_v31 = vld [vmem:[#allocation3 + $0x68] ss:$16 sps:$4 sm:$0xff]   ;;  %v2413_v32 = vld [vmem:[#allocation3 + $0x84] ss:$16 sps:$4 sm:$0xff]  }
  0x22   :  { %1887 = vmatprep.subr.mxu0 %v102_v21  ;;  %1932 = vmatprep.subr.mxu1 %v102_v21  ;;  %v2431_v38 = vld [vmem:[#allocation3 + $0xac] ss:$16 sps:$4 sm:$0xff]   ;;  %v2437_v39 = vld [vmem:[#allocation3 + $0xa0] ss:$16 sps:$4 sm:$0xff]   ;;  %v2445_v42 = vld [vmem:[#allocation3 + $0xc4] ss:$16 sps:$4 sm:$0xff]  }
  0x23   :  { %v2447_v43 = vld [vmem:[#allocation3 + $0xcc] ss:$16 sps:$4 sm:$0xff]   ;;  %v2471_v49 = vld [vmem:[#allocation3 + $0xe8] ss:$16 sps:$4 sm:$0xff]   ;;  %v249_v52 = vld [vmem:[%s2979_s3] sm:$0xf] }
  0x24   :  { %993 = vperm.xlu1 %1943, %v991_v19   ;;  %867 = vperm.xlu0 %1942, %v865_v20  }
  0x25   :  { %1888 = vmatpush3.msra.mxu0 %v102_v21  ;;  %1936 = vmatpush3.msra.mxu1 %v102_v21  ;;  %v2379_v21 = vld [vmem:[#allocation3 + $0x44] ss:$16 sps:$4 sm:$0xff]  }
  0x26   :  { %1914 = vmatprep.subr.bf16.mxu1 %v1913_v30  ;;  %1922 = vmatprep.subr.bf16.mxu0 %v1921_v33  ;;  %v2405_v30 = vld [vmem:[#allocation3 + $0x60] ss:$16 sps:$4 sm:$0xff]   ;;  %v2415_v33 = vld [vmem:[#allocation3 + $0x8c] ss:$16 sps:$4 sm:$0xff]  }
  0x28   :  { %1245 = vperm.xlu1 %1943, %v1243_v22   ;;  %1119 = vperm.xlu0 %1942, %v1117_v23   ;;  %v2381_v22 = vld [vmem:[#allocation3 + $0x4c] ss:$16 sps:$4 sm:$0xff]  }
  0x2c   :  { %1497 = vperm.xlu1 %1943, %v1495_v24   ;;  %1371 = vperm.xlu0 %1942, %v1369_v25   ;;  %v2387_v24 = vld [vmem:[#allocation3 + $0x40] ss:$16 sps:$4 sm:$0xff]   ;;  %v2389_v25 = vld [vmem:[#allocation3 + $0x48] ss:$16 sps:$4 sm:$0xff]  }
  0x30   :  { %1749 = vperm.xlu1 %1943, %v1747_v26   ;;  %1623 = vperm.xlu0 %1942, %v1621_v27   ;;  %v2397_v27 = vld [vmem:[#allocation3 + $0x64] ss:$16 sps:$4 sm:$0xff]  }
  0x93   :  { %v56_v36 = vpop.permute.xlu1 %55  ;;  %v50_v37 = vpop.permute.xlu0 %49 }
  0x94   :  { %vm72_vm9 = vcmp.eq.s32.totalorder %v50_v37, %v47_v35  ;;  %vm74_vm10 = vcmp.eq.s32.totalorder %v56_v36, %v47_v35  ;;  %v2423_v36 = vld [vmem:[#allocation3 + $0x88] ss:$16 sps:$4 sm:$0xff]   ;;  %v2429_v37 = vld [vmem:[#allocation3 + $0xa4] ss:$16 sps:$4 sm:$0xff]  }
  0x95   :  { %v1766_v41 = vsel %vm72_vm9, 1.0, %v2180_v40  ;;  %v1768_v47 = vsel %vm74_vm10, 1.0, %v2180_v40 }
  0x96   :  { %1889 = vmatprep.mubr.msk.f32.mxu0 %vm103_vm8, %v1766_v41  ;;  %v2439_v41 = vld [vmem:[#allocation3 + $0xa8] ss:$16 sps:$4 sm:$0xff]  }
  0x97   :  { %v59_v44 = vpop.permute.xlu1 %58  ;;  %v53_v45 = vpop.permute.xlu0 %52 }
  0x98   :  { %vm75_vm11 = vcmp.eq.s32.totalorder %v59_v44, %v47_v35  ;;  %vm73_vm12 = vcmp.eq.s32.totalorder %v53_v45, %v47_v35  ;;  %v2453_v44 = vld [vmem:[#allocation3 + $0xc0] ss:$16 sps:$4 sm:$0xff]   ;;  %v2455_v45 = vld [vmem:[#allocation3 + $0xc8] ss:$16 sps:$4 sm:$0xff]  }
  0x99   :  { %v1767_v51 = vsel %vm73_vm12, 1.0, %v2180_v40  ;;  %v1769_v56 = vsel %vm75_vm11, 1.0, %v2180_v40 }
  0x9a   :  { %1890 = vmatmul.mubr.msk.f32.vlgmr.msra.gmra.mrb[0].mxu0 %vm103_vm8, %v1767_v51 }
  0x9b   :  { %v65_v57 = vpop.permute.xlu1 %64  ;;  %v62_v58 = vpop.permute.xlu0 %61  ;;  %1892 = vmatprep.mubr.msk.f32.mxu0 %vm103_vm8, %v1768_v47  ;;  %1924 = vmatpush1.bf16.msra.mxu0 %v1923_v46  ;;  %v2461_v46 = vld [vmem:[#allocation3 + $0xe4] ss:$16 sps:$4 sm:$0xff]   ;;  %v2463_v47 = vld [vmem:[#allocation3 + $0xec] ss:$16 sps:$4 sm:$0xff]  }
  0x9c   :  { %vm77_vm13 = vcmp.eq.s32.totalorder %v65_v57, %v47_v35  ;;  %vm76_vm14 = vcmp.eq.s32.totalorder %v62_v58, %v47_v35  ;;  %1926 = vmatprep.subr.bf16.mxu0 %v1925_v48  ;;  %v2469_v48 = vld [vmem:[#allocation3 + $0xe0] ss:$16 sps:$4 sm:$0xff]  }
  0x9d   :  { %v1771_v61 = vsel %vm77_vm13, 1.0, %v2180_v40  ;;  %v1770_v62 = vsel %vm76_vm14, 1.0, %v2180_v40 }
  0x9e   :  { %1893 = vmatmul.mubr.msk.f32.gmra.mrb[2].mxu0 %vm103_vm8, %v1769_v56  ;;  %1895 = vmatprep.mubr.msk.f32.mxu1 %vm103_vm8, %v1770_v62 }
  0x9f   :  { %v71_v3 = vpop.permute.xlu1 %70  ;;  %1896 = vmatmul.mubr.msk.f32.vlgmr.msra.gmra.mrb[0].mxu1 %vm103_vm8, %v1771_v61  ;;  %v68_v4 = vpop.permute.xlu0 %67  ;;  %1928 = vmatpush1.bf16.msra.mxu0 %v1927_v59 }
  0xa0   :  { %vm79_vm15 = vcmp.eq.s32.totalorder %v71_v3, %v47_v35  ;;  %vm78_vm0 = vcmp.eq.s32.totalorder %v68_v4, %v47_v35  ;;  %1916 = vmatpush1.bf16.msra.mxu1 %v1915_v60  ;;  %473 = vmatprep.mubr.f32.mxu0 %v2180_v40  ;;  %v2421_v35 = vld [vmem:[#allocation3 + $0x80] ss:$16 sps:$4 sm:$0xff]  }
  0xa1   :  { %v1773_v6 = vsel %vm79_vm15, 1.0, %v2180_v40  ;;  %v1772_v7 = vsel %vm78_vm0, 1.0, %v2180_v40  ;;  %1918 = vmatprep.subr.bf16.mxu1 %v1917_v63  ;;  %795 = vmatprep.subr.bf16.mxu0 %v2355_v9 }
  0xa2   :  { %1898 = vmatprep.mubr.msk.f32.mxu1 %vm103_vm8, %v1772_v7 }
  0xa3   :  { %1899 = vmatmul.mubr.msk.f32.gmra.mrb[2].mxu1 %vm103_vm8, %v1773_v6 }
  0xa4   :  { %1920 = vmatpush1.bf16.msra.mxu1 %v1919_v5  ;;  %360 = vmatprep.mubr.f32.mxu1 %v2180_v40 }
  0xa5   :  { %754 = vmatprep.subr.bf16.mxu1 %v2353_v8 }
 0x16d   :  { %v1891_v12 = vpop.f32.mrb[0].mxu0 }
 0x16e   :  { %v194_v13 = vpop.f32.mrb[1].mxu0 }
 0x16f   :  { %1782 = vmatmul.mubr.msk.f32.vlgmr.msra.gmra.mrb[4].mxu1 %vm271_vm1, %v194_v13  ;;  %1790 = vmatmul.mubr.msk.f32.vlgmr.msra.gmra.mrb[4].mxu0 %vm271_vm1, %v194_v13 }
 0x170   :  { %755 = vmatpush1.bf16.msra.mxu1 %v2359_v10  ;;  %796 = vmatpush1.bf16.msra.mxu0 %v2361_v11 }
 0x171   :  { %v1894_v18 = vpop.f32.mrb[2].mxu0  ;;  %366 = vmatprep.mubr.f32.mxu1 %v2180_v40  ;;  %479 = vmatprep.mubr.f32.mxu0 %v2180_v40 }
 0x172   :  { %v204_v19 = vpop.f32.mrb[3].mxu0  ;;  %v1897_v20 = vpop.f32.mrb[0].mxu1  ;;  %756 = vmatprep.subr.bf16.mxu1 %v2363_v14  ;;  %797 = vmatprep.subr.bf16.mxu0 %v2365_v15 }
 0x173   :  { %v214_v23 = vpop.f32.mrb[1].mxu1  ;;  %1783 = vmatmul.mubr.msk.f32.gmra.mrb[6].mxu1 %vm271_vm1, %v1891_v12  ;;  %1791 = vmatmul.mubr.msk.f32.gmra.mrb[6].mxu0 %vm271_vm1, %v1891_v12 }
 0x174   :  { %757 = vmatpush1.bf16.msra.mxu1 %v2371_v16  ;;  %798 = vmatpush1.bf16.msra.mxu0 %v2373_v17 }
 0x175   :  { %372 = vmatprep.mubr.f32.mxu1 %v2180_v40  ;;  %485 = vmatprep.mubr.f32.mxu0 %v2180_v40 }
 0x176   :  { %v2393_v26 = vpop.f32.mrb[2].mxu1  ;;  %758 = vmatprep.subr.bf16.mxu1 %v2379_v21  ;;  %799 = vmatprep.subr.bf16.mxu0 %v2381_v22 }
 0x177   :  { %v224_v29 = vpop.f32.mrb[3].mxu1  ;;  %1784 = vmatmul.mubr.msk.f32.gmra.mrb[8].mxu1 %vm271_vm1, %v204_v19  ;;  %1792 = vmatmul.mubr.msk.f32.gmra.mrb[8].mxu0 %vm271_vm1, %v204_v19 }
 0x178   :  { %759 = vmatpush1.bf16.msra.mxu1 %v2387_v24  ;;  %800 = vmatpush1.bf16.msra.mxu0 %v2389_v25 }
 0x179   :  { %378 = vmatprep.mubr.f32.mxu1 %v2180_v40  ;;  %491 = vmatprep.mubr.f32.mxu0 %v2180_v40 }
 0x17a   :  { %760 = vmatprep.subr.bf16.mxu1 %v2397_v27  ;;  %801 = vmatprep.subr.bf16.mxu0 %v2399_v28 }
 0x17b   :  { %1785 = vmatmul.mubr.msk.f32.gmra.mrb[10].mxu1 %vm271_vm1, %v1894_v18  ;;  %1793 = vmatmul.mubr.msk.f32.gmra.mrb[10].mxu0 %vm271_vm1, %v1894_v18 }
 0x17c   :  { %761 = vmatpush1.bf16.msra.mxu1 %v2405_v30  ;;  %802 = vmatpush1.bf16.msra.mxu0 %v2407_v31 }
 0x17d   :  { %384 = vmatprep.mubr.f32.mxu1 %v2180_v40  ;;  %497 = vmatprep.mubr.f32.mxu0 %v2180_v40 }
 0x17e   :  { %762 = vmatprep.subr.bf16.mxu1 %v2413_v32  ;;  %803 = vmatprep.subr.bf16.mxu0 %v2415_v33 }
 0x17f   :  { %1786 = vmatmul.mubr.msk.f32.gmra.mrb[12].mxu1 %vm271_vm1, %v214_v23  ;;  %1794 = vmatmul.mubr.msk.f32.gmra.mrb[12].mxu0 %vm271_vm1, %v214_v23 }
 0x180   :  { %763 = vmatpush1.bf16.msra.mxu1 %v2421_v35  ;;  %804 = vmatpush1.bf16.msra.mxu0 %v2423_v36 }
 0x181   :  { %390 = vmatprep.mubr.f32.mxu1 %v2180_v40  ;;  %503 = vmatprep.mubr.f32.mxu0 %v2180_v40 }
 0x182   :  { %764 = vmatprep.subr.bf16.mxu1 %v2429_v37  ;;  %805 = vmatprep.subr.bf16.mxu0 %v2431_v38 }
 0x183   :  { %1787 = vmatmul.mubr.msk.f32.gmra.mrb[14].mxu1 %vm271_vm1, %v1897_v20  ;;  %1795 = vmatmul.mubr.msk.f32.gmra.mrb[14].mxu0 %vm271_vm1, %v1897_v20 }
 0x184   :  { %765 = vmatpush1.bf16.msra.mxu1 %v2437_v39  ;;  %806 = vmatpush1.bf16.msra.mxu0 %v2439_v41 }
 0x185   :  { %396 = vmatprep.mubr.f32.mxu1 %v2180_v40  ;;  %509 = vmatprep.mubr.f32.mxu0 %v2180_v40 }
 0x186   :  { %766 = vmatprep.subr.bf16.mxu1 %v2445_v42  ;;  %807 = vmatprep.subr.bf16.mxu0 %v2447_v43 }
 0x187   :  { %1788 = vmatmul.mubr.msk.f32.gmra.mrb[16].mxu1 %vm271_vm1, %v224_v29  ;;  %1796 = vmatmul.mubr.msk.f32.gmra.mrb[16].mxu0 %vm271_vm1, %v224_v29 }
 0x188   :  { %767 = vmatpush1.bf16.msra.mxu1 %v2453_v44  ;;  %808 = vmatpush1.bf16.msra.mxu0 %v2455_v45 }
 0x189   :  { %402 = vmatprep.mubr.f32.mxu1 %v2180_v40  ;;  %515 = vmatprep.mubr.f32.mxu0 %v2180_v40  ;;  %v252_v40 = vshrl.u32 %v46_v34, 7 }
 0x18a   :  { %768 = vmatprep.subr.bf16.mxu1 %v2461_v46  ;;  %809 = vmatprep.subr.bf16.mxu0 %v2463_v47 }
 0x18b   :  { %1789 = vmatmul.mubr.msk.f32.gmra.mrb[18].mxu1 %vm271_vm1, %v2393_v26  ;;  %1797 = vmatmul.mubr.msk.f32.gmra.mrb[18].mxu0 %vm271_vm1, %v2393_v26  ;;  %v253_v50 = vsub.s32 0, %v252_v40  ;;  %v261_v51 = vsub.s32 2, %v252_v40  ;;  %v257_v53 = vsub.s32 1, %v252_v40  ;;  %v265_v54 = vsub.s32 3, %v252_v40 }
 0x18c   :  { %769 = vmatpush1.bf16.msra.mxu1 %v2469_v48  ;;  %810 = vmatpush1.bf16.msra.mxu0 %v2471_v49 }
 0x18d   :  { %786 = vmatprep.mubr.bf16.mxu1 %v2983_v0  ;;  %827 = vmatprep.mubr.bf16.mxu0 %v2983_v0  ;;  %v254_v55 = vrot.slane %v249_v52, %v253_v50  ;;  %v262_v56 = vrot.slane %v249_v52, %v261_v51  ;;  %v2527_v57 = vrot.slane %v249_v52, %v257_v53 }
 0x18e   :  { %880 = vmatprep.subr.bf16.mxu1 %v2353_v8  ;;  %921 = vmatprep.subr.bf16.mxu0 %v2355_v9  ;;  %v2529_v58 = vrot.slane %v249_v52, %v265_v54 }
 0x18f   :  { %787 = vmatmul.mubr.bf16.vlgmr.msra.gmra.mrb[20].mxu1 %v2983_v0  ;;  %828 = vmatmul.mubr.bf16.vlgmr.msra.gmra.mrb[20].mxu0 %v2983_v0 }
 0x190   :  { %881 = vmatpush1.bf16.msra.mxu1 %v2359_v10  ;;  %922 = vmatpush1.bf16.msra.mxu0 %v2361_v11 }
 0x191   :  { %882 = vmatprep.subr.bf16.mxu1 %v2363_v14  ;;  %923 = vmatprep.subr.bf16.mxu0 %v2365_v15 }
 0x192   :  { %912 = vmatprep.mubr.bf16.mxu1 %v2983_v0  ;;  %953 = vmatprep.mubr.bf16.mxu0 %v2983_v0 }
 0x194   :  { %883 = vmatpush1.bf16.msra.mxu1 %v2371_v16  ;;  %924 = vmatpush1.bf16.msra.mxu0 %v2373_v17 }
 0x195   :  { %884 = vmatprep.subr.bf16.mxu1 %v2379_v21  ;;  %925 = vmatprep.subr.bf16.mxu0 %v2381_v22 }
 0x198   :  { %885 = vmatpush1.bf16.msra.mxu1 %v2387_v24  ;;  %926 = vmatpush1.bf16.msra.mxu0 %v2389_v25 }
 0x199   :  { %886 = vmatprep.subr.bf16.mxu1 %v2397_v27  ;;  %927 = vmatprep.subr.bf16.mxu0 %v2399_v28 }
 0x19c   :  { %887 = vmatpush1.bf16.msra.mxu1 %v2405_v30  ;;  %928 = vmatpush1.bf16.msra.mxu0 %v2407_v31 }
 0x19d   :  { %888 = vmatprep.subr.bf16.mxu1 %v2413_v32  ;;  %929 = vmatprep.subr.bf16.mxu0 %v2415_v33 }
 0x1a0   :  { %889 = vmatpush1.bf16.msra.mxu1 %v2421_v35  ;;  %930 = vmatpush1.bf16.msra.mxu0 %v2423_v36 }
 0x1a1   :  { %890 = vmatprep.subr.bf16.mxu1 %v2429_v37  ;;  %931 = vmatprep.subr.bf16.mxu0 %v2431_v38 }
 0x1a4   :  { %891 = vmatpush1.bf16.msra.mxu1 %v2437_v39  ;;  %932 = vmatpush1.bf16.msra.mxu0 %v2439_v41 }
 0x1a5   :  { %892 = vmatprep.subr.bf16.mxu1 %v2445_v42  ;;  %933 = vmatprep.subr.bf16.mxu0 %v2447_v43 }
 0x1a8   :  { %893 = vmatpush1.bf16.msra.mxu1 %v2453_v44  ;;  %934 = vmatpush1.bf16.msra.mxu0 %v2455_v45 }
 0x1a9   :  { %894 = vmatprep.subr.bf16.mxu1 %v2461_v46  ;;  %935 = vmatprep.subr.bf16.mxu0 %v2463_v47 }
 0x1ac   :  { %895 = vmatpush1.bf16.msra.mxu1 %v2469_v48  ;;  %936 = vmatpush1.bf16.msra.mxu0 %v2471_v49 }
 0x1ad   :  { %1006 = vmatprep.subr.bf16.mxu1 %v2353_v8  ;;  %1047 = vmatprep.subr.bf16.mxu0 %v2355_v9 }
 0x242   :  { %v362_v59 = vpop.f32.mrb[4].mxu1  ;;  %v475_v60 = vpop.f32.mrb[4].mxu0 }
 0x243   :  { %v2531_v61 = vadd.f32 %v362_v59, %v254_v55  ;;  %v2533_v62 = vadd.f32 %v475_v60, %v262_v56  ;;  %v364_v34 = vpop.f32.mrb[5].mxu1  ;;  %v477_v63 = vpop.f32.mrb[5].mxu0 }
 0x244   :  { %v2536_v1 = vadd.f32 %v364_v34, %v2527_v57  ;;  %v2539_v2 = vadd.f32 %v477_v63, %v2529_v58 }
 0x246   :  { %v368_v3 = vpop.f32.mrb[6].mxu1  ;;  %v481_v4 = vpop.f32.mrb[6].mxu0 }
 0x247   :  { %v2541_v5 = vadd.f32 %v368_v3, %v254_v55  ;;  %v2543_v6 = vadd.f32 %v481_v4, %v262_v56  ;;  %v370_v7 = vpop.f32.mrb[7].mxu1  ;;  %v483_v12 = vpop.f32.mrb[7].mxu0 }
 0x248   :  { %v2546_v13 = vadd.f32 %v370_v7, %v2527_v57  ;;  %v2549_v18 = vadd.f32 %v483_v12, %v2529_v58 }
 0x24a   :  { %v374_v19 = vpop.f32.mrb[8].mxu1  ;;  %v487_v20 = vpop.f32.mrb[8].mxu0 }
 0x24b   :  { %v2551_v23 = vadd.f32 %v374_v19, %v254_v55  ;;  %v2553_v26 = vadd.f32 %v487_v20, %v262_v56  ;;  %v376_v29 = vpop.f32.mrb[9].mxu1  ;;  %v489_v40 = vpop.f32.mrb[9].mxu0 }
 0x24c   :  { %v2556_v50 = vadd.f32 %v376_v29, %v2527_v57  ;;  %v2559_v51 = vadd.f32 %v489_v40, %v2529_v58 }
 0x24e   :  { %v380_v52 = vpop.f32.mrb[10].mxu1  ;;  %v493_v53 = vpop.f32.mrb[10].mxu0 }
 0x24f   :  { %v2561_v54 = vadd.f32 %v380_v52, %v254_v55  ;;  %v2563_v59 = vadd.f32 %v493_v53, %v262_v56  ;;  %v382_v60 = vpop.f32.mrb[11].mxu1  ;;  %v495_v34 = vpop.f32.mrb[11].mxu0 }
 0x250   :  { %v2566_v63 = vadd.f32 %v382_v60, %v2527_v57  ;;  %v2569_v3 = vadd.f32 %v495_v34, %v2529_v58 }
 0x252   :  { %2985 = vst [vmem:[#allocation6_spill] sm:$0xff] %v2566_v63  ;;  %2986 = vst [vmem:[#allocation7_spill] sm:$0xff] %v2569_v3  ;;  %v386_v4 = vpop.f32.mrb[12].mxu1  ;;  %v499_v7 = vpop.f32.mrb[12].mxu0 }
 0x253   :  { %v2571_v12 = vadd.f32 %v386_v4, %v254_v55  ;;  %v2573_v19 = vadd.f32 %v499_v7, %v262_v56  ;;  %v388_v20 = vpop.f32.mrb[13].mxu1  ;;  %v501_v29 = vpop.f32.mrb[13].mxu0 }
 0x254   :  { %v2576_v40 = vadd.f32 %v388_v20, %v2527_v57  ;;  %v2579_v52 = vadd.f32 %v501_v29, %v2529_v58 }
 0x255   :  { %2987 = vst [vmem:[#allocation8_spill] sm:$0xff] %v2571_v12  ;;  %2988 = vst [vmem:[#allocation9_spill] sm:$0xff] %v2573_v19 }
 0x256   :  { %2989 = vst [vmem:[#allocation10_spill] sm:$0xff] %v2576_v40  ;;  %2990 = vst [vmem:[#allocation11_spill] sm:$0xff] %v2579_v52  ;;  %v392_v53 = vpop.f32.mrb[14].mxu1  ;;  %v505_v60 = vpop.f32.mrb[14].mxu0 }
 0x257   :  { %v2581_v0 = vadd.f32 %v392_v53, %v254_v55  ;;  %v2583_v34 = vadd.f32 %v505_v60, %v262_v56  ;;  %v394_v3 = vpop.f32.mrb[15].mxu1  ;;  %v507_v63 = vpop.f32.mrb[15].mxu0 }
 0x258   :  { %v2586_v4 = vadd.f32 %v394_v3, %v2527_v57  ;;  %v2589_v7 = vadd.f32 %v507_v63, %v2529_v58 }
 0x259   :  { %2991 = vst [vmem:[#allocation12_spill] sm:$0xff] %v2581_v0  ;;  %2992 = vst [vmem:[#allocation13_spill] sm:$0xff] %v2583_v34 }
 0x25a   :  { %2993 = vst [vmem:[#allocation14_spill] sm:$0xff] %v2586_v4  ;;  %2994 = vst [vmem:[#allocation15_spill] sm:$0xff] %v2589_v7  ;;  %v398_v19 = vpop.f32.mrb[16].mxu1  ;;  %v511_v20 = vpop.f32.mrb[16].mxu0 }
 0x25b   :  { %v2591_v40 = vadd.f32 %v398_v19, %v254_v55  ;;  %v2593_v29 = vadd.f32 %v511_v20, %v262_v56  ;;  %v400_v52 = vpop.f32.mrb[17].mxu1  ;;  %v513_v12 = vpop.f32.mrb[17].mxu0 }
 0x25c   :  { %v2596_v53 = vadd.f32 %v400_v52, %v2527_v57  ;;  %v2599_v60 = vadd.f32 %v513_v12, %v2529_v58 }
 0x25d   :  { %2995 = vst [vmem:[#allocation16_spill] sm:$0xff] %v2591_v40  ;;  %2996 = vst [vmem:[#allocation17_spill] sm:$0xff] %v2593_v29 }
 0x25e   :  { %2997 = vst [vmem:[#allocation18_spill] sm:$0xff] %v2596_v53  ;;  %2998 = vst [vmem:[#allocation19_spill] sm:$0xff] %v2599_v60  ;;  %v404_v34 = vpop.f32.mrb[18].mxu1  ;;  %v517_v3 = vpop.f32.mrb[18].mxu0 }
 0x25f   :  { %v2601_v4 = vadd.f32 %v404_v34, %v254_v55  ;;  %v2603_v63 = vadd.f32 %v517_v3, %v262_v56  ;;  %v406_v7 = vpop.f32.mrb[19].mxu1  ;;  %v519_v0 = vpop.f32.mrb[19].mxu0 }
 0x260   :  { %v2606_v19 = vadd.f32 %v406_v7, %v2527_v57  ;;  %v2609_v20 = vadd.f32 %v519_v0, %v2529_v58 }
 0x261   :  { %2999 = vst [vmem:[#allocation20_spill] sm:$0xff] %v2603_v63 }
 0x262   :  { %3000 = vst [vmem:[#allocation21_spill] sm:$0xff] %v2606_v19  ;;  %3001 = vst [vmem:[#allocation22_spill] sm:$0xff] %v2609_v20  ;;  %v788_v29 = vpop.f32.mrb[20].mxu1  ;;  %v829_v52 = vpop.f32.mrb[20].mxu0 }
 0x263   :  { %v836_v53 = vadd.f32 %v788_v29, %v2531_v61  ;;  %v838_v12 = vadd.f32 %v829_v52, %v2533_v62  ;;  %v790_v60 = vpop.f32.mrb[21].mxu1  ;;  %v831_v40 = vpop.f32.mrb[21].mxu0 }
 0x264   :  { %v837_v55 = vadd.f32 %v790_v60, %v2536_v1  ;;  %v839_v56 = vadd.f32 %v831_v40, %v2539_v2  ;;  %v792_v34 = vpop.f32.mrb[22].mxu1  ;;  %v833_v3 = vpop.f32.mrb[22].mxu0 }
 0x265   :  { %v1830_v63 = vmul.f32 -1.442695, %v836_v53  ;;  %v793_v57 = vpop.f32.mrb[23].mxu1  ;;  %v834_v7 = vpop.f32.mrb[23].mxu0  ;;  %v1832_v0 = vmul.f32 -1.442695, %v838_v12 }
 0x266   :  { %v1831_v19 = vmul.f32 -1.442695, %v837_v55 }
 0x267   :  { %1992 = vpow2.f32 %v1830_v63  ;;  %v2618_v63 = vpop.permute.xlu0 %867 }
 0x268   :  { %1994 = vpow2.f32 %v1831_v19  ;;  %vm869_vm2 = vcmp.eq.s32.totalorder %v2618_v63, 1 }
 0x269   :  { %1996 = vtanh.f32 %v839_v56  ;;  %vm1833_vm3 = vmpackc.low %vm869_vm2, %vm869_vm2  ;;  %v3002_v56 = vmov 0  }
 0x26a   :  { %1998 = vpow2.f32 %v1832_v0 }
 0x271   :  { %v1993_v58 = vpop.eup %1992 }
 0x272   :  { %v849_v20 = vadd.f32 1.0, %v1993_v58  ;;  %v1995_v61 = vpop.eup %1994 }
 0x273   :  { %v850_v62 = vadd.f32 1.0, %v1995_v61  ;;  %v1997_v1 = vpop.eup %1996 }
 0x274   :  { %2000 = vrcp.f32 %v849_v20  ;;  %v1999_v29 = vpop.eup %1998 }
 0x275   :  { %2002 = vrcp.f32 %v850_v62  ;;  %v851_v53 = vadd.f32 1.0, %v1999_v29 }
 0x277   :  { %2004 = vrcp.f32 %v851_v53 }
 0x27e   :  { %v2001_v2 = vpop.eup %2000 }
 0x27f   :  { %v860_v40 = vmul.f32 %v2001_v2, %v1997_v1  ;;  %v2003_v60 = vpop.eup %2002 }
 0x280   :  { %v859_v52 = vmul.f32 0.0, %v2003_v60 }
 0x281   :  { %v2005_v19 = vpop.eup %2004 }
 0x282   :  { %v2615_v34 = vadd.f32 %v860_v40, %v859_v52 }
 0x284   :  { %2006 = vtanh.f32 %v2615_v34 }
 0x28e   :  { %v2007_v12 = vpop.eup %2006 }
 0x28f   :  { %v2621_v20 = vmul.f32 %v2007_v12, %v2005_v19 }
 0x291   :  { %v1834_v55 = vpack.c.bf16 %v2621_v20, %v2621_v20 }
 0x293   :  { %1835 = vmatmul.mubr.msk.bf16.vlgmr.msra.gmra.mrb[24].mxu1 %vm1833_vm3, %v1834_v55  ;;  %1838 = vmatmul.mubr.msk.bf16.vlgmr.msra.gmra.mrb[24].mxu0 %vm1833_vm3, %v1834_v55 }
 0x294   :  { %1007 = vmatpush1.bf16.msra.mxu1 %v2359_v10  ;;  %1048 = vmatpush1.bf16.msra.mxu0 %v2361_v11 }
 0x295   :  { %1008 = vmatprep.subr.bf16.mxu1 %v2363_v14  ;;  %1049 = vmatprep.subr.bf16.mxu0 %v2365_v15 }
 0x296   :  { %1038 = vmatprep.mubr.bf16.mxu1 %v3002_v56  ;;  %1079 = vmatprep.mubr.bf16.mxu0 %v3002_v56 }
 0x298   :  { %1009 = vmatpush1.bf16.msra.mxu1 %v2371_v16  ;;  %1050 = vmatpush1.bf16.msra.mxu0 %v2373_v17 }
 0x299   :  { %1010 = vmatprep.subr.bf16.mxu1 %v2379_v21  ;;  %1051 = vmatprep.subr.bf16.mxu0 %v2381_v22 }
 0x29c   :  { %1011 = vmatpush1.bf16.msra.mxu1 %v2387_v24  ;;  %1052 = vmatpush1.bf16.msra.mxu0 %v2389_v25 }
 0x29d   :  { %1012 = vmatprep.subr.bf16.mxu1 %v2397_v27  ;;  %1053 = vmatprep.subr.bf16.mxu0 %v2399_v28 }
 0x2a0   :  { %1013 = vmatpush1.bf16.msra.mxu1 %v2405_v30  ;;  %1054 = vmatpush1.bf16.msra.mxu0 %v2407_v31 }
 0x2a1   :  { %1014 = vmatprep.subr.bf16.mxu1 %v2413_v32  ;;  %1055 = vmatprep.subr.bf16.mxu0 %v2415_v33 }
 0x2a4   :  { %1015 = vmatpush1.bf16.msra.mxu1 %v2421_v35  ;;  %1056 = vmatpush1.bf16.msra.mxu0 %v2423_v36 }
 0x2a5   :  { %1016 = vmatprep.subr.bf16.mxu1 %v2429_v37  ;;  %1057 = vmatprep.subr.bf16.mxu0 %v2431_v38 }
 0x2a8   :  { %1017 = vmatpush1.bf16.msra.mxu1 %v2437_v39  ;;  %1058 = vmatpush1.bf16.msra.mxu0 %v2439_v41 }
 0x2a9   :  { %1018 = vmatprep.subr.bf16.mxu1 %v2445_v42  ;;  %1059 = vmatprep.subr.bf16.mxu0 %v2447_v43 }
 0x2ac   :  { %1019 = vmatpush1.bf16.msra.mxu1 %v2453_v44  ;;  %1060 = vmatpush1.bf16.msra.mxu0 %v2455_v45 }
 0x2ad   :  { %1020 = vmatprep.subr.bf16.mxu1 %v2461_v46  ;;  %1061 = vmatprep.subr.bf16.mxu0 %v2463_v47 }
 0x2b0   :  { %1021 = vmatpush1.bf16.msra.mxu1 %v2469_v48  ;;  %1062 = vmatpush1.bf16.msra.mxu0 %v2471_v49 }
 0x2b1   :  { %1132 = vmatprep.subr.bf16.mxu1 %v2353_v8  ;;  %1173 = vmatprep.subr.bf16.mxu0 %v2355_v9 }
 0x366   :  { %v914_v3 = vpop.f32.mrb[24].mxu1  ;;  %v955_v57 = vpop.f32.mrb[24].mxu0 }
 0x367   :  { %v962_v7 = vadd.f32 %v914_v3, %v2541_v5  ;;  %v964_v0 = vadd.f32 %v955_v57, %v2543_v6  ;;  %v916_v58 = vpop.f32.mrb[25].mxu1  ;;  %v957_v61 = vpop.f32.mrb[25].mxu0 }
 0x368   :  { %v963_v62 = vadd.f32 %v916_v58, %v2546_v13  ;;  %v965_v1 = vadd.f32 %v957_v61, %v2549_v18  ;;  %v918_v29 = vpop.f32.mrb[26].mxu1  ;;  %v959_v2 = vpop.f32.mrb[26].mxu0 }
 0x369   :  { %v1839_v40 = vmul.f32 -1.442695, %v962_v7  ;;  %v919_v60 = vpop.f32.mrb[27].mxu1  ;;  %v960_v53 = vpop.f32.mrb[27].mxu0  ;;  %v1841_v19 = vmul.f32 -1.442695, %v964_v0 }
 0x36a   :  { %v1840_v52 = vmul.f32 -1.442695, %v963_v62  ;;  %v871_v7 = vsel %vm869_vm2, %v2615_v34, 0.0  ;;  %v994_v62 = vpop.permute.xlu1 %993  ;;  %v870_v53 = vsel %vm869_vm2, %v2621_v20, 0.0 }
 0x36b   :  { %2008 = vpow2.f32 %v1839_v40  ;;  %vm995_vm4 = vcmp.eq.s32.totalorder %v994_v62, 1 }
 0x36c   :  { %2010 = vpow2.f32 %v1840_v52 }
 0x36d   :  { %2012 = vtanh.f32 %v965_v1 }
 0x36e   :  { %2014 = vpow2.f32 %v1841_v19 }
 0x375   :  { %v2009_v12 = vpop.eup %2008 }
 0x376   :  { %v975_v55 = vadd.f32 1.0, %v2009_v12  ;;  %v2011_v5 = vpop.eup %2010 }
 0x377   :  { %v976_v6 = vadd.f32 1.0, %v2011_v5  ;;  %v2013_v13 = vpop.eup %2012 }
 0x378   :  { %2016 = vrcp.f32 %v975_v55  ;;  %v2015_v3 = vpop.eup %2014 }
 0x379   :  { %2018 = vrcp.f32 %v976_v6  ;;  %v977_v61 = vadd.f32 1.0, %v2015_v3 }
 0x37b   :  { %2020 = vrcp.f32 %v977_v61 }
 0x382   :  { %v2017_v18 = vpop.eup %2016 }
 0x383   :  { %v986_v57 = vmul.f32 %v2017_v18, %v2013_v13  ;;  %v2019_v58 = vpop.eup %2018 }
 0x384   :  { %v985_v0 = vmul.f32 %v2019_v58, %v871_v7 }
 0x385   :  { %v2021_v2 = vpop.eup %2020 }
 0x386   :  { %v987_v29 = vadd.f32 %v986_v57, %v985_v0 }
 0x388   :  { %2022 = vtanh.f32 %v987_v29  ;;  %v2669_v1 = vsel %vm995_vm4, %v987_v29, %v871_v7 }
 0x392   :  { %v2023_v40 = vpop.eup %2022 }
 0x393   :  { %v989_v60 = vmul.f32 %v2023_v40, %v2021_v2 }
 0x395   :  { %v2674_v52 = vsel %vm995_vm4, %v989_v60, %v870_v53 }
 0x396   :  { %v1005_v34 = vpack.c.bf16 %v2674_v52, %v2674_v52 }
 0x398   :  { %1039 = vmatmul.mubr.bf16.vlgmr.msra.gmra.mrb[28].mxu1 %v1005_v34  ;;  %1080 = vmatmul.mubr.bf16.vlgmr.msra.gmra.mrb[28].mxu0 %v1005_v34  ;;  %v1120_v34 = vpop.permute.xlu0 %1119 }
 0x399   :  { %1133 = vmatpush1.bf16.msra.mxu1 %v2359_v10  ;;  %1174 = vmatpush1.bf16.msra.mxu0 %v2361_v11  ;;  %vm1121_vm5 = vcmp.eq.s32.totalorder %v1120_v34, 1 }
 0x39a   :  { %1134 = vmatprep.subr.bf16.mxu1 %v2363_v14  ;;  %1175 = vmatprep.subr.bf16.mxu0 %v2365_v15 }
 0x39b   :  { %1164 = vmatprep.mubr.bf16.mxu1 %v3002_v56  ;;  %1205 = vmatprep.mubr.bf16.mxu0 %v3002_v56 }
 0x39d   :  { %1135 = vmatpush1.bf16.msra.mxu1 %v2371_v16  ;;  %1176 = vmatpush1.bf16.msra.mxu0 %v2373_v17 }
 0x39e   :  { %1136 = vmatprep.subr.bf16.mxu1 %v2379_v21  ;;  %1177 = vmatprep.subr.bf16.mxu0 %v2381_v22 }
 0x3a1   :  { %1137 = vmatpush1.bf16.msra.mxu1 %v2387_v24  ;;  %1178 = vmatpush1.bf16.msra.mxu0 %v2389_v25 }
 0x3a2   :  { %1138 = vmatprep.subr.bf16.mxu1 %v2397_v27  ;;  %1179 = vmatprep.subr.bf16.mxu0 %v2399_v28 }
 0x3a5   :  { %1139 = vmatpush1.bf16.msra.mxu1 %v2405_v30  ;;  %1180 = vmatpush1.bf16.msra.mxu0 %v2407_v31 }
 0x3a6   :  { %1140 = vmatprep.subr.bf16.mxu1 %v2413_v32  ;;  %1181 = vmatprep.subr.bf16.mxu0 %v2415_v33 }
 0x3a9   :  { %1141 = vmatpush1.bf16.msra.mxu1 %v2421_v35  ;;  %1182 = vmatpush1.bf16.msra.mxu0 %v2423_v36 }
 0x3aa   :  { %1142 = vmatprep.subr.bf16.mxu1 %v2429_v37  ;;  %1183 = vmatprep.subr.bf16.mxu0 %v2431_v38 }
 0x3ad   :  { %1143 = vmatpush1.bf16.msra.mxu1 %v2437_v39  ;;  %1184 = vmatpush1.bf16.msra.mxu0 %v2439_v41 }
 0x3ae   :  { %1144 = vmatprep.subr.bf16.mxu1 %v2445_v42  ;;  %1185 = vmatprep.subr.bf16.mxu0 %v2447_v43 }
 0x3b1   :  { %1145 = vmatpush1.bf16.msra.mxu1 %v2453_v44  ;;  %1186 = vmatpush1.bf16.msra.mxu0 %v2455_v45 }
 0x3b2   :  { %1146 = vmatprep.subr.bf16.mxu1 %v2461_v46  ;;  %1187 = vmatprep.subr.bf16.mxu0 %v2463_v47 }
 0x3b5   :  { %1147 = vmatpush1.bf16.msra.mxu1 %v2469_v48  ;;  %1188 = vmatpush1.bf16.msra.mxu0 %v2471_v49 }
 0x3b6   :  { %1258 = vmatprep.subr.bf16.mxu1 %v2353_v8  ;;  %1299 = vmatprep.subr.bf16.mxu0 %v2355_v9 }
 0x46b   :  { %v1040_v63 = vpop.f32.mrb[28].mxu1  ;;  %v1081_v20 = vpop.f32.mrb[28].mxu0 }
 0x46c   :  { %v1088_v19 = vadd.f32 %v1040_v63, %v2551_v23  ;;  %v1090_v12 = vadd.f32 %v1081_v20, %v2553_v26  ;;  %v1042_v55 = vpop.f32.mrb[29].mxu1  ;;  %v1083_v5 = vpop.f32.mrb[29].mxu0 }
 0x46d   :  { %v1089_v6 = vadd.f32 %v1042_v55, %v2556_v50  ;;  %v1091_v13 = vadd.f32 %v1083_v5, %v2559_v51  ;;  %v1044_v3 = vpop.f32.mrb[30].mxu1  ;;  %v1085_v18 = vpop.f32.mrb[30].mxu0 }
 0x46e   :  { %v1842_v57 = vmul.f32 -1.442695, %v1088_v19  ;;  %v1045_v58 = vpop.f32.mrb[31].mxu1  ;;  %v1086_v7 = vpop.f32.mrb[31].mxu0  ;;  %v1844_v62 = vmul.f32 -1.442695, %v1090_v12 }
 0x46f   :  { %v1843_v61 = vmul.f32 -1.442695, %v1089_v6  ;;  %v3003_v7 = vld [vmem:[#allocation6_spill] sm:$0xff] }
 0x470   :  { %2024 = vpow2.f32 %v1842_v57 }
 0x471   :  { %2026 = vpow2.f32 %v1843_v61 }
 0x472   :  { %2028 = vtanh.f32 %v1091_v13 }
 0x473   :  { %2030 = vpow2.f32 %v1844_v62  ;;  %v3004_v62 = vld [vmem:[#allocation7_spill] sm:$0xff] }
 0x47a   :  { %v2025_v0 = vpop.eup %2024 }
 0x47b   :  { %v1101_v29 = vadd.f32 1.0, %v2025_v0  ;;  %v2027_v23 = vpop.eup %2026 }
 0x47c   :  { %v1102_v26 = vadd.f32 1.0, %v2027_v23  ;;  %v2029_v50 = vpop.eup %2028 }
 0x47d   :  { %2032 = vrcp.f32 %v1101_v29  ;;  %v2031_v2 = vpop.eup %2030 }
 0x47e   :  { %2034 = vrcp.f32 %v1102_v26  ;;  %v1103_v53 = vadd.f32 1.0, %v2031_v2 }
 0x480   :  { %2036 = vrcp.f32 %v1103_v53 }
 0x487   :  { %v2033_v51 = vpop.eup %2032 }
 0x488   :  { %v1112_v40 = vmul.f32 %v2033_v51, %v2029_v50  ;;  %v2035_v60 = vpop.eup %2034 }
 0x489   :  { %v1111_v63 = vmul.f32 %v2035_v60, %v2669_v1 }
 0x48a   :  { %v2037_v12 = vpop.eup %2036 }
 0x48b   :  { %v1113_v20 = vadd.f32 %v1112_v40, %v1111_v63 }
 0x48d   :  { %2038 = vtanh.f32 %v1113_v20  ;;  %v2718_v19 = vsel %vm1121_vm5, %v1113_v20, %v2669_v1 }
 0x497   :  { %v2039_v55 = vpop.eup %2038 }
 0x498   :  { %v1115_v5 = vmul.f32 %v2039_v55, %v2037_v12  ;;  %v1246_v55 = vpop.permute.xlu1 %1245 }
 0x499   :  { %vm1247_vm6 = vcmp.eq.s32.totalorder %v1246_v55, 1  ;;  %v2864_v55 = vld [vmem:[#allocation3 + $0x68] ss:$16 sps:$4 sm:$0xff]  }
 0x49a   :  { %v2721_v6 = vsel %vm1121_vm5, %v1115_v5, %v2674_v52 }
 0x49b   :  { %v1131_v13 = vpack.c.bf16 %v2721_v6, %v2721_v6 }
 0x49d   :  { %1165 = vmatmul.mubr.bf16.vlgmr.msra.gmra.mrb[32].mxu1 %v1131_v13  ;;  %1206 = vmatmul.mubr.bf16.vlgmr.msra.gmra.mrb[32].mxu0 %v1131_v13 }
 0x49e   :  { %1259 = vmatpush1.bf16.msra.mxu1 %v2359_v10  ;;  %1300 = vmatpush1.bf16.msra.mxu0 %v2361_v11 }
 0x49f   :  { %1260 = vmatprep.subr.bf16.mxu1 %v2363_v14  ;;  %1301 = vmatprep.subr.bf16.mxu0 %v2365_v15 }
 0x4a0   :  { %1290 = vmatprep.mubr.bf16.mxu1 %v3002_v56  ;;  %1331 = vmatprep.mubr.bf16.mxu0 %v3002_v56 }
 0x4a2   :  { %1261 = vmatpush1.bf16.msra.mxu1 %v2371_v16  ;;  %1302 = vmatpush1.bf16.msra.mxu0 %v2373_v17 }
 0x4a3   :  { %1262 = vmatprep.subr.bf16.mxu1 %v2379_v21  ;;  %1303 = vmatprep.subr.bf16.mxu0 %v2381_v22 }
 0x4a6   :  { %1263 = vmatpush1.bf16.msra.mxu1 %v2387_v24  ;;  %1304 = vmatpush1.bf16.msra.mxu0 %v2389_v25 }
 0x4a7   :  { %1264 = vmatprep.subr.bf16.mxu1 %v2397_v27  ;;  %1305 = vmatprep.subr.bf16.mxu0 %v2399_v28 }
 0x4aa   :  { %1265 = vmatpush1.bf16.msra.mxu1 %v2405_v30  ;;  %1306 = vmatpush1.bf16.msra.mxu0 %v2407_v31 }
 0x4ab   :  { %1266 = vmatprep.subr.bf16.mxu1 %v2413_v32  ;;  %1307 = vmatprep.subr.bf16.mxu0 %v2415_v33 }
 0x4ae   :  { %1267 = vmatpush1.bf16.msra.mxu1 %v2421_v35  ;;  %1308 = vmatpush1.bf16.msra.mxu0 %v2423_v36 }
 0x4af   :  { %1268 = vmatprep.subr.bf16.mxu1 %v2429_v37  ;;  %1309 = vmatprep.subr.bf16.mxu0 %v2431_v38 }
 0x4b2   :  { %1269 = vmatpush1.bf16.msra.mxu1 %v2437_v39  ;;  %1310 = vmatpush1.bf16.msra.mxu0 %v2439_v41 }
 0x4b3   :  { %1270 = vmatprep.subr.bf16.mxu1 %v2445_v42  ;;  %1311 = vmatprep.subr.bf16.mxu0 %v2447_v43 }
 0x4b6   :  { %1271 = vmatpush1.bf16.msra.mxu1 %v2453_v44  ;;  %1312 = vmatpush1.bf16.msra.mxu0 %v2455_v45 }
 0x4b7   :  { %1272 = vmatprep.subr.bf16.mxu1 %v2461_v46  ;;  %1313 = vmatprep.subr.bf16.mxu0 %v2463_v47 }
 0x4ba   :  { %1273 = vmatpush1.bf16.msra.mxu1 %v2469_v48  ;;  %1314 = vmatpush1.bf16.msra.mxu0 %v2471_v49 }
 0x4bb   :  { %1384 = vmatprep.subr.bf16.mxu1 %v2353_v8  ;;  %1425 = vmatprep.subr.bf16.mxu0 %v2355_v9 }
 0x570   :  { %v1166_v1 = vpop.f32.mrb[32].mxu1  ;;  %v1207_v52 = vpop.f32.mrb[32].mxu0 }
 0x571   :  { %v1214_v3 = vadd.f32 %v1166_v1, %v2561_v54  ;;  %v1216_v18 = vadd.f32 %v1207_v52, %v2563_v59  ;;  %v1168_v57 = vpop.f32.mrb[33].mxu1  ;;  %v1209_v58 = vpop.f32.mrb[33].mxu0 }
 0x572   :  { %v1215_v61 = vadd.f32 %v1168_v57, %v3003_v7  ;;  %v1217_v0 = vadd.f32 %v1209_v58, %v3004_v62  ;;  %v1170_v29 = vpop.f32.mrb[34].mxu1  ;;  %v1211_v23 = vpop.f32.mrb[34].mxu0 }
 0x573   :  { %v1845_v26 = vmul.f32 -1.442695, %v1214_v3  ;;  %v1171_v50 = vpop.f32.mrb[35].mxu1  ;;  %v1212_v2 = vpop.f32.mrb[35].mxu0  ;;  %v1847_v9 = vmul.f32 -1.442695, %v1216_v18 }
 0x574   :  { %v1846_v8 = vmul.f32 -1.442695, %v1215_v61  ;;  %v2823_v2 = vld [vmem:[#allocation3] ss:$16 sps:$4 sm:$0xff]  }
 0x575   :  { %2040 = vpow2.f32 %v1845_v26 }
 0x576   :  { %2042 = vpow2.f32 %v1846_v8  ;;  %v2826_v8 = vld [vmem:[#allocation3 + $0x8] ss:$16 sps:$4 sm:$0xff]  }
 0x577   :  { %2044 = vtanh.f32 %v1217_v0 }
 0x578   :  { %2046 = vpow2.f32 %v1847_v9  ;;  %v2829_v9 = vld [vmem:[#allocation3 + $0x24] ss:$16 sps:$4 sm:$0xff]  }
 0x57f   :  { %v2041_v51 = vpop.eup %2040 }
 0x580   :  { %v1227_v40 = vadd.f32 1.0, %v2041_v51  ;;  %v2043_v54 = vpop.eup %2042  ;;  %v2832_v51 = vld [vmem:[#allocation3 + $0x2c] ss:$16 sps:$4 sm:$0xff]  }
 0x581   :  { %v1228_v59 = vadd.f32 1.0, %v2043_v54  ;;  %v2045_v60 = vpop.eup %2044  ;;  %v2840_v54 = vld [vmem:[#allocation3 + $0x28] ss:$16 sps:$4 sm:$0xff]  }
 0x582   :  { %2048 = vrcp.f32 %v1227_v40  ;;  %v2047_v53 = vpop.eup %2046  ;;  %v2837_v40 = vld [vmem:[#allocation3 + $0x20] ss:$16 sps:$4 sm:$0xff]  }
 0x583   :  { %2050 = vrcp.f32 %v1228_v59  ;;  %v1229_v12 = vadd.f32 1.0, %v2047_v53  ;;  %v2843_v59 = vld [vmem:[#allocation3 + $0x44] ss:$16 sps:$4 sm:$0xff]   ;;  %v2849_v53 = vld [vmem:[#allocation3 + $0x40] ss:$16 sps:$4 sm:$0xff]  }
 0x585   :  { %2052 = vrcp.f32 %v1229_v12  ;;  %v2861_v12 = vld [vmem:[#allocation3 + $0x60] ss:$16 sps:$4 sm:$0xff]  }
 0x58c   :  { %v2049_v34 = vpop.eup %2048 }
 0x58d   :  { %v1238_v63 = vmul.f32 %v2049_v34, %v2045_v60  ;;  %v2051_v20 = vpop.eup %2050  ;;  %v2846_v60 = vld [vmem:[#allocation3 + $0x4c] ss:$16 sps:$4 sm:$0xff]   ;;  %v2852_v34 = vld [vmem:[#allocation3 + $0x48] ss:$16 sps:$4 sm:$0xff]  }
 0x58e   :  { %v1237_v5 = vmul.f32 %v2051_v20, %v2718_v19  ;;  %v2858_v20 = vld [vmem:[#allocation3 + $0x6c] ss:$16 sps:$4 sm:$0xff]  }
 0x58f   :  { %v2053_v52 = vpop.eup %2052 }
 0x590   :  { %v1239_v13 = vadd.f32 %v1238_v63, %v1237_v5  ;;  %v2855_v63 = vld [vmem:[#allocation3 + $0x64] ss:$16 sps:$4 sm:$0xff]  }
 0x591   :  { %v2867_v5 = vld [vmem:[#allocation3 + $0x84] ss:$16 sps:$4 sm:$0xff]  }
 0x592   :  { %2054 = vtanh.f32 %v1239_v13  ;;  %v2765_v1 = vsel %vm1247_vm6, %v1239_v13, %v2718_v19  ;;  %v2870_v13 = vld [vmem:[#allocation3 + $0x8c] ss:$16 sps:$4 sm:$0xff]  }
 0x59c   :  { %v2055_v3 = vpop.eup %2054 }
 0x59d   :  { %v1241_v18 = vmul.f32 %v2055_v3, %v2053_v52  ;;  %v2876_v52 = vld [vmem:[#allocation3 + $0x88] ss:$16 sps:$4 sm:$0xff]   ;;  %v2879_v3 = vld [vmem:[#allocation3 + $0xa4] ss:$16 sps:$4 sm:$0xff]  }
 0x59f   :  { %v2768_v57 = vsel %vm1247_vm6, %v1241_v18, %v2721_v6  ;;  %v1372_v6 = vpop.permute.xlu0 %1371  ;;  %v2882_v18 = vld [vmem:[#allocation3 + $0xac] ss:$16 sps:$4 sm:$0xff]  }
 0x5a0   :  { %v1257_v58 = vpack.c.bf16 %v2768_v57, %v2768_v57  ;;  %vm1373_vm7 = vcmp.eq.s32.totalorder %v1372_v6, 1 }
 0x5a2   :  { %1291 = vmatmul.mubr.bf16.vlgmr.msra.gmra.mrb[36].mxu1 %v1257_v58  ;;  %1332 = vmatmul.mubr.bf16.vlgmr.msra.gmra.mrb[36].mxu0 %v1257_v58  ;;  %v2888_v58 = vld [vmem:[#allocation3 + $0xa8] ss:$16 sps:$4 sm:$0xff]  }
 0x5a3   :  { %1385 = vmatpush1.bf16.msra.mxu1 %v2359_v10  ;;  %1426 = vmatpush1.bf16.msra.mxu0 %v2361_v11  ;;  %v2804_v10 = vld [vmem:[#allocation3 + $0x4] ss:$16 sps:$4 sm:$0xff]   ;;  %v2807_v11 = vld [vmem:[#allocation3 + $0xc] ss:$16 sps:$4 sm:$0xff]  }
 0x5a4   :  { %1386 = vmatprep.subr.bf16.mxu1 %v2363_v14  ;;  %1427 = vmatprep.subr.bf16.mxu0 %v2365_v15 }
 0x5a5   :  { %1416 = vmatprep.mubr.bf16.mxu1 %v3002_v56  ;;  %1457 = vmatprep.mubr.bf16.mxu0 %v3002_v56 }
 0x5a7   :  { %1387 = vmatpush1.bf16.msra.mxu1 %v2371_v16  ;;  %1428 = vmatpush1.bf16.msra.mxu0 %v2373_v17  ;;  %v3005_v16 = vld [vmem:[#allocation8_spill] sm:$0xff] }
 0x5a8   :  { %1388 = vmatprep.subr.bf16.mxu1 %v2379_v21  ;;  %1429 = vmatprep.subr.bf16.mxu0 %v2381_v22  ;;  %v3006_v21 = vld [vmem:[#allocation9_spill] sm:$0xff] }
 0x5ab   :  { %1389 = vmatpush1.bf16.msra.mxu1 %v2387_v24  ;;  %1430 = vmatpush1.bf16.msra.mxu0 %v2389_v25 }
 0x5ac   :  { %1390 = vmatprep.subr.bf16.mxu1 %v2397_v27  ;;  %1431 = vmatprep.subr.bf16.mxu0 %v2399_v28  ;;  %v3007_v27 = vld [vmem:[#allocation10_spill] sm:$0xff] }
 0x5af   :  { %1391 = vmatpush1.bf16.msra.mxu1 %v2405_v30  ;;  %1432 = vmatpush1.bf16.msra.mxu0 %v2407_v31  ;;  %v3008_v30 = vld [vmem:[#allocation11_spill] sm:$0xff] }
 0x5b0   :  { %1392 = vmatprep.subr.bf16.mxu1 %v2413_v32  ;;  %1433 = vmatprep.subr.bf16.mxu0 %v2415_v33 }
 0x5b3   :  { %1393 = vmatpush1.bf16.msra.mxu1 %v2421_v35  ;;  %1434 = vmatpush1.bf16.msra.mxu0 %v2423_v36 }
 0x5b4   :  { %1394 = vmatprep.subr.bf16.mxu1 %v2429_v37  ;;  %1435 = vmatprep.subr.bf16.mxu0 %v2431_v38 }
 0x5b7   :  { %1395 = vmatpush1.bf16.msra.mxu1 %v2437_v39  ;;  %1436 = vmatpush1.bf16.msra.mxu0 %v2439_v41 }
 0x5b8   :  { %1396 = vmatprep.subr.bf16.mxu1 %v2445_v42  ;;  %1437 = vmatprep.subr.bf16.mxu0 %v2447_v43 }
 0x5bb   :  { %1397 = vmatpush1.bf16.msra.mxu1 %v2453_v44  ;;  %1438 = vmatpush1.bf16.msra.mxu0 %v2455_v45 }
 0x5bc   :  { %1398 = vmatprep.subr.bf16.mxu1 %v2461_v46  ;;  %1439 = vmatprep.subr.bf16.mxu0 %v2463_v47 }
 0x5bf   :  { %1399 = vmatpush1.bf16.msra.mxu1 %v2469_v48  ;;  %1440 = vmatpush1.bf16.msra.mxu0 %v2471_v49 }
 0x5c0   :  { %1510 = vmatprep.subr.bf16.mxu1 %v2804_v10  ;;  %1551 = vmatprep.subr.bf16.mxu0 %v2807_v11 }
 0x675   :  { %v1292_v14 = vpop.f32.mrb[36].mxu1  ;;  %v1333_v15 = vpop.f32.mrb[36].mxu0 }
 0x676   :  { %v1340_v17 = vadd.f32 %v1292_v14, %v3005_v16  ;;  %v1342_v22 = vadd.f32 %v1333_v15, %v3006_v21  ;;  %v1294_v24 = vpop.f32.mrb[37].mxu1  ;;  %v1335_v25 = vpop.f32.mrb[37].mxu0  ;;  %v2891_v14 = vld [vmem:[#allocation3 + $0xc4] ss:$16 sps:$4 sm:$0xff]   ;;  %v2894_v15 = vld [vmem:[#allocation3 + $0xcc] ss:$16 sps:$4 sm:$0xff]  }
 0x677   :  { %v1341_v28 = vadd.f32 %v1294_v24, %v3007_v27  ;;  %v1343_v31 = vadd.f32 %v1335_v25, %v3008_v30  ;;  %v1296_v32 = vpop.f32.mrb[38].mxu1  ;;  %v1337_v33 = vpop.f32.mrb[38].mxu0  ;;  %v2897_v16 = vld [vmem:[#allocation3 + $0xc0] ss:$16 sps:$4 sm:$0xff]   ;;  %v2903_v21 = vld [vmem:[#allocation3 + $0xe4] ss:$16 sps:$4 sm:$0xff]  }
 0x678   :  { %v1848_v35 = vmul.f32 -1.442695, %v1340_v17  ;;  %v1297_v36 = vpop.f32.mrb[39].mxu1  ;;  %v1338_v37 = vpop.f32.mrb[39].mxu0  ;;  %v1850_v39 = vmul.f32 -1.442695, %v1342_v22 }
 0x679   :  { %v1849_v38 = vmul.f32 -1.442695, %v1341_v28  ;;  %v2900_v17 = vld [vmem:[#allocation3 + $0xc8] ss:$16 sps:$4 sm:$0xff]   ;;  %v2906_v22 = vld [vmem:[#allocation3 + $0xec] ss:$16 sps:$4 sm:$0xff]  }
 0x67a   :  { %2056 = vpow2.f32 %v1848_v35  ;;  %v2909_v24 = vld [vmem:[#allocation3 + $0xe0] ss:$16 sps:$4 sm:$0xff]   ;;  %v2912_v25 = vld [vmem:[#allocation3 + $0xe8] ss:$16 sps:$4 sm:$0xff]  }
 0x67b   :  { %2058 = vpow2.f32 %v1849_v38  ;;  %v3009_v30 = vld [vmem:[#allocation12_spill] sm:$0xff]  ;;  %v3010_v32 = vld [vmem:[#allocation13_spill] sm:$0xff]  ;;  %v3011_v37 = vld [vmem:[#allocation14_spill] sm:$0xff] }
 0x67c   :  { %2060 = vtanh.f32 %v1343_v31 }
 0x67d   :  { %2062 = vpow2.f32 %v1850_v39  ;;  %v3012_v39 = vld [vmem:[#allocation15_spill] sm:$0xff] }
 0x684   :  { %v2057_v41 = vpop.eup %2056 }
 0x685   :  { %v1353_v42 = vadd.f32 1.0, %v2057_v41  ;;  %v2059_v43 = vpop.eup %2058 }
 0x686   :  { %v1354_v44 = vadd.f32 1.0, %v2059_v43  ;;  %v2061_v45 = vpop.eup %2060 }
 0x687   :  { %2064 = vrcp.f32 %v1353_v42  ;;  %v2063_v46 = vpop.eup %2062 }
 0x688   :  { %2066 = vrcp.f32 %v1354_v44  ;;  %v1355_v19 = vadd.f32 1.0, %v2063_v46 }
 0x68a   :  { %2068 = vrcp.f32 %v1355_v19 }
 0x691   :  { %v2065_v47 = vpop.eup %2064 }
 0x692   :  { %v1364_v48 = vmul.f32 %v2065_v47, %v2061_v45  ;;  %v2067_v49 = vpop.eup %2066 }
 0x693   :  { %v1363_v7 = vmul.f32 %v2067_v49, %v2765_v1 }
 0x694   :  { %v2069_v0 = vpop.eup %2068 }
 0x695   :  { %v1365_v61 = vadd.f32 %v1364_v48, %v1363_v7 }
 0x697   :  { %2070 = vtanh.f32 %v1365_v61  ;;  %v2816_v62 = vsel %vm1373_vm7, %v1365_v61, %v2765_v1  ;;  %v2873_v1 = vld [vmem:[#allocation3 + $0x80] ss:$16 sps:$4 sm:$0xff]  }
 0x6a1   :  { %v2071_v29 = vpop.eup %2070 }
 0x6a2   :  { %v1367_v23 = vmul.f32 %v2071_v29, %v2069_v0 }
 0x6a4   :  { %v2819_v26 = vsel %vm1373_vm7, %v1367_v23, %v2768_v57  ;;  %v2885_v57 = vld [vmem:[#allocation3 + $0xa0] ss:$16 sps:$4 sm:$0xff]  }
 0x6a5   :  { %v1383_v50 = vpack.c.bf16 %v2819_v26, %v2819_v26 }
 0x6a7   :  { %1417 = vmatmul.mubr.bf16.vlgmr.msra.gmra.mrb[40].mxu1 %v1383_v50  ;;  %1458 = vmatmul.mubr.bf16.vlgmr.msra.gmra.mrb[40].mxu0 %v1383_v50  ;;  %v1498_v50 = vpop.permute.xlu1 %1497 }
 0x6a8   :  { %1511 = vmatpush1.bf16.msra.mxu1 %v2823_v2  ;;  %1552 = vmatpush1.bf16.msra.mxu0 %v2826_v8  ;;  %vm1499_vm8 = vcmp.eq.s32.totalorder %v1498_v50, 1 }
 0x6a9   :  { %1512 = vmatprep.subr.bf16.mxu1 %v2829_v9  ;;  %1553 = vmatprep.subr.bf16.mxu0 %v2832_v51 }
 0x6aa   :  { %1542 = vmatprep.mubr.bf16.mxu1 %v3002_v56  ;;  %1583 = vmatprep.mubr.bf16.mxu0 %v3002_v56 }
 0x6ac   :  { %1513 = vmatpush1.bf16.msra.mxu1 %v2837_v40  ;;  %1554 = vmatpush1.bf16.msra.mxu0 %v2840_v54 }
 0x6ad   :  { %1514 = vmatprep.subr.bf16.mxu1 %v2843_v59  ;;  %1555 = vmatprep.subr.bf16.mxu0 %v2846_v60 }
 0x6b0   :  { %1515 = vmatpush1.bf16.msra.mxu1 %v2849_v53  ;;  %1556 = vmatpush1.bf16.msra.mxu0 %v2852_v34 }
 0x6b1   :  { %1516 = vmatprep.subr.bf16.mxu1 %v2855_v63  ;;  %1557 = vmatprep.subr.bf16.mxu0 %v2858_v20 }
 0x6b4   :  { %1517 = vmatpush1.bf16.msra.mxu1 %v2861_v12  ;;  %1558 = vmatpush1.bf16.msra.mxu0 %v2864_v55 }
 0x6b5   :  { %1518 = vmatprep.subr.bf16.mxu1 %v2867_v5  ;;  %1559 = vmatprep.subr.bf16.mxu0 %v2870_v13 }
 0x6b8   :  { %1519 = vmatpush1.bf16.msra.mxu1 %v2873_v1  ;;  %1560 = vmatpush1.bf16.msra.mxu0 %v2876_v52 }
 0x6b9   :  { %1520 = vmatprep.subr.bf16.mxu1 %v2879_v3  ;;  %1561 = vmatprep.subr.bf16.mxu0 %v2882_v18 }
 0x6bc   :  { %1521 = vmatpush1.bf16.msra.mxu1 %v2885_v57  ;;  %1562 = vmatpush1.bf16.msra.mxu0 %v2888_v58 }
 0x6bd   :  { %1522 = vmatprep.subr.bf16.mxu1 %v2891_v14  ;;  %1563 = vmatprep.subr.bf16.mxu0 %v2894_v15 }
 0x6c0   :  { %1523 = vmatpush1.bf16.msra.mxu1 %v2897_v16  ;;  %1564 = vmatpush1.bf16.msra.mxu0 %v2900_v17 }
 0x6c1   :  { %1524 = vmatprep.subr.bf16.mxu1 %v2903_v21  ;;  %1565 = vmatprep.subr.bf16.mxu0 %v2906_v22 }
 0x6c4   :  { %1525 = vmatpush1.bf16.msra.mxu1 %v2909_v24  ;;  %1566 = vmatpush1.bf16.msra.mxu0 %v2912_v25 }
 0x6c5   :  { %1636 = vmatprep.subr.bf16.mxu1 %v2804_v10  ;;  %1677 = vmatprep.subr.bf16.mxu0 %v2807_v11 }
 0x77a   :  { %v1418_v27 = vpop.f32.mrb[40].mxu1  ;;  %v1459_v28 = vpop.f32.mrb[40].mxu0 }
 0x77b   :  { %v1466_v31 = vadd.f32 %v1418_v27, %v3009_v30  ;;  %v1468_v33 = vadd.f32 %v1459_v28, %v3010_v32  ;;  %v1420_v35 = vpop.f32.mrb[41].mxu1  ;;  %v1461_v36 = vpop.f32.mrb[41].mxu0 }
 0x77c   :  { %v1467_v38 = vadd.f32 %v1420_v35, %v3011_v37  ;;  %v1469_v41 = vadd.f32 %v1461_v36, %v3012_v39  ;;  %v1422_v42 = vpop.f32.mrb[42].mxu1  ;;  %v1463_v43 = vpop.f32.mrb[42].mxu0 }
 0x77d   :  { %v1851_v44 = vmul.f32 -1.442695, %v1466_v31  ;;  %v1423_v45 = vpop.f32.mrb[43].mxu1  ;;  %v1464_v46 = vpop.f32.mrb[43].mxu0  ;;  %v1853_v11 = vmul.f32 -1.442695, %v1468_v33 }
 0x77e   :  { %v1852_v10 = vmul.f32 -1.442695, %v1467_v38  ;;  %v3017_v46 = vld [vmem:[#allocation20_spill] sm:$0xff] }
 0x77f   :  { %2072 = vpow2.f32 %v1851_v44 }
 0x780   :  { %2074 = vpow2.f32 %v1852_v10 }
 0x781   :  { %2076 = vtanh.f32 %v1469_v41 }
 0x782   :  { %2078 = vpow2.f32 %v1853_v11 }
 0x789   :  { %v2073_v47 = vpop.eup %2072 }
 0x78a   :  { %v1479_v48 = vadd.f32 1.0, %v2073_v47  ;;  %v2075_v49 = vpop.eup %2074 }
 0x78b   :  { %v1480_v19 = vadd.f32 1.0, %v2075_v49  ;;  %v2077_v6 = vpop.eup %2076 }
 0x78c   :  { %2080 = vrcp.f32 %v1479_v48  ;;  %v2079_v7 = vpop.eup %2078  ;;  %v3018_v48 = vld [vmem:[#allocation21_spill] sm:$0xff] }
 0x78d   :  { %2082 = vrcp.f32 %v1480_v19  ;;  %v1481_v23 = vadd.f32 1.0, %v2079_v7  ;;  %v3019_v19 = vld [vmem:[#allocation22_spill] sm:$0xff] }
 0x78f   :  { %2084 = vrcp.f32 %v1481_v23 }
 0x796   :  { %v2081_v61 = vpop.eup %2080 }
 0x797   :  { %v1490_v0 = vmul.f32 %v2081_v61, %v2077_v6  ;;  %v2083_v29 = vpop.eup %2082 }
 0x798   :  { %v1489_v27 = vmul.f32 %v2083_v29, %v2816_v62 }
 0x799   :  { %v2085_v31 = vpop.eup %2084 }
 0x79a   :  { %v1491_v28 = vadd.f32 %v1490_v0, %v1489_v27 }
 0x79c   :  { %2086 = vtanh.f32 %v1491_v28  ;;  %v2923_v30 = vsel %vm1499_vm8, %v1491_v28, %v2816_v62 }
 0x7a6   :  { %v2087_v32 = vpop.eup %2086 }
 0x7a7   :  { %v1493_v33 = vmul.f32 %v2087_v32, %v2085_v31 }
 0x7a9   :  { %v2926_v35 = vsel %vm1499_vm8, %v1493_v33, %v2819_v26  ;;  %v3013_v26 = vld [vmem:[#allocation16_spill] sm:$0xff] }
 0x7aa   :  { %v1509_v36 = vpack.c.bf16 %v2926_v35, %v2926_v35 }
 0x7ac   :  { %1543 = vmatmul.mubr.bf16.vlgmr.msra.gmra.mrb[44].mxu1 %v1509_v36  ;;  %1584 = vmatmul.mubr.bf16.vlgmr.msra.gmra.mrb[44].mxu0 %v1509_v36 }
 0x7ad   :  { %1637 = vmatpush1.bf16.msra.mxu1 %v2823_v2  ;;  %1678 = vmatpush1.bf16.msra.mxu0 %v2826_v8  ;;  %v3014_v8 = vld [vmem:[#allocation17_spill] sm:$0xff] }
 0x7ae   :  { %1638 = vmatprep.subr.bf16.mxu1 %v2829_v9  ;;  %1679 = vmatprep.subr.bf16.mxu0 %v2832_v51 }
 0x7af   :  { %1668 = vmatprep.mubr.bf16.mxu1 %v3002_v56  ;;  %1709 = vmatprep.mubr.bf16.mxu0 %v3002_v56 }
 0x7b1   :  { %1639 = vmatpush1.bf16.msra.mxu1 %v2837_v40  ;;  %1680 = vmatpush1.bf16.msra.mxu0 %v2840_v54  ;;  %v3015_v54 = vld [vmem:[#allocation18_spill] sm:$0xff] }
 0x7b2   :  { %1640 = vmatprep.subr.bf16.mxu1 %v2843_v59  ;;  %1681 = vmatprep.subr.bf16.mxu0 %v2846_v60  ;;  %v3016_v60 = vld [vmem:[#allocation19_spill] sm:$0xff] }
 0x7b5   :  { %1641 = vmatpush1.bf16.msra.mxu1 %v2849_v53  ;;  %1682 = vmatpush1.bf16.msra.mxu0 %v2852_v34 }
 0x7b6   :  { %1642 = vmatprep.subr.bf16.mxu1 %v2855_v63  ;;  %1683 = vmatprep.subr.bf16.mxu0 %v2858_v20 }
 0x7b9   :  { %1643 = vmatpush1.bf16.msra.mxu1 %v2861_v12  ;;  %1684 = vmatpush1.bf16.msra.mxu0 %v2864_v55 }
 0x7ba   :  { %1644 = vmatprep.subr.bf16.mxu1 %v2867_v5  ;;  %1685 = vmatprep.subr.bf16.mxu0 %v2870_v13 }
 0x7bd   :  { %1645 = vmatpush1.bf16.msra.mxu1 %v2873_v1  ;;  %1686 = vmatpush1.bf16.msra.mxu0 %v2876_v52 }
 0x7be   :  { %1646 = vmatprep.subr.bf16.mxu1 %v2879_v3  ;;  %1687 = vmatprep.subr.bf16.mxu0 %v2882_v18 }
 0x7c1   :  { %1647 = vmatpush1.bf16.msra.mxu1 %v2885_v57  ;;  %1688 = vmatpush1.bf16.msra.mxu0 %v2888_v58 }
 0x7c2   :  { %1648 = vmatprep.subr.bf16.mxu1 %v2891_v14  ;;  %1689 = vmatprep.subr.bf16.mxu0 %v2894_v15 }
 0x7c5   :  { %1649 = vmatpush1.bf16.msra.mxu1 %v2897_v16  ;;  %1690 = vmatpush1.bf16.msra.mxu0 %v2900_v17 }
 0x7c6   :  { %1650 = vmatprep.subr.bf16.mxu1 %v2903_v21  ;;  %1691 = vmatprep.subr.bf16.mxu0 %v2906_v22  ;;  %v1624_v21 = vpop.permute.xlu0 %1623 }
 0x7c7   :  { %vm1625_vm9 = vcmp.eq.s32.totalorder %v1624_v21, 1 }
 0x7c9   :  { %1651 = vmatpush1.bf16.msra.mxu1 %v2909_v24  ;;  %1692 = vmatpush1.bf16.msra.mxu0 %v2912_v25 }
 0x87f   :  { %v1544_v56 = vpop.f32.mrb[44].mxu1  ;;  %v1585_v62 = vpop.f32.mrb[44].mxu0 }
 0x880   :  { %v1592_v2 = vadd.f32 %v1544_v56, %v3013_v26  ;;  %v1594_v9 = vadd.f32 %v1585_v62, %v3014_v8  ;;  %v1546_v51 = vpop.f32.mrb[45].mxu1  ;;  %v1587_v40 = vpop.f32.mrb[45].mxu0 }
 0x881   :  { %v1593_v59 = vadd.f32 %v1546_v51, %v3015_v54  ;;  %v1595_v53 = vadd.f32 %v1587_v40, %v3016_v60  ;;  %v1548_v34 = vpop.f32.mrb[46].mxu1  ;;  %v1589_v63 = vpop.f32.mrb[46].mxu0 }
 0x882   :  { %v1854_v20 = vmul.f32 -1.442695, %v1592_v2  ;;  %v1549_v12 = vpop.f32.mrb[47].mxu1  ;;  %v1590_v55 = vpop.f32.mrb[47].mxu0  ;;  %v1856_v13 = vmul.f32 -1.442695, %v1594_v9 }
 0x883   :  { %v1855_v5 = vmul.f32 -1.442695, %v1593_v59  ;;  %v1750_v9 = vpop.permute.xlu1 %1749 }
 0x884   :  { %2088 = vpow2.f32 %v1854_v20  ;;  %vm1751_vm10 = vcmp.eq.s32.totalorder %v1750_v9, 1 }
 0x885   :  { %2090 = vpow2.f32 %v1855_v5 }
 0x886   :  { %2092 = vtanh.f32 %v1595_v53 }
 0x887   :  { %2094 = vpow2.f32 %v1856_v13 }
 0x88e   :  { %v2089_v1 = vpop.eup %2088 }
 0x88f   :  { %v1605_v52 = vadd.f32 1.0, %v2089_v1  ;;  %v2091_v3 = vpop.eup %2090 }
 0x890   :  { %v1606_v18 = vadd.f32 1.0, %v2091_v3  ;;  %v2093_v57 = vpop.eup %2092 }
 0x891   :  { %2096 = vrcp.f32 %v1605_v52  ;;  %v2095_v58 = vpop.eup %2094 }
 0x892   :  { %2098 = vrcp.f32 %v1606_v18  ;;  %v1607_v17 = vadd.f32 1.0, %v2095_v58 }
 0x894   :  { %2100 = vrcp.f32 %v1607_v17 }
 0x89b   :  { %v2097_v14 = vpop.eup %2096 }
 0x89c   :  { %v1616_v15 = vmul.f32 %v2097_v14, %v2093_v57  ;;  %v2099_v16 = vpop.eup %2098 }
 0x89d   :  { %v1615_v22 = vmul.f32 %v2099_v16, %v2923_v30 }
 0x89e   :  { %v2101_v37 = vpop.eup %2100 }
 0x89f   :  { %v1617_v24 = vadd.f32 %v1616_v15, %v1615_v22 }
 0x8a1   :  { %2102 = vtanh.f32 %v1617_v24  ;;  %v1627_v25 = vsel %vm1625_vm9, %v1617_v24, %v2923_v30 }
 0x8ab   :  { %v2103_v38 = vpop.eup %2102 }
 0x8ac   :  { %v1619_v39 = vmul.f32 %v2103_v38, %v2101_v37 }
 0x8ae   :  { %v1626_v41 = vsel %vm1625_vm9, %v1619_v39, %v2926_v35 }
 0x8af   :  { %v1635_v42 = vpack.c.bf16 %v1626_v41, %v1626_v41 }
 0x8b1   :  { %1669 = vmatmul.mubr.bf16.vlgmr.msra.gmra.mrb[48].mxu1 %v1635_v42  ;;  %1710 = vmatmul.mubr.bf16.vlgmr.msra.gmra.mrb[48].mxu0 %v1635_v42 }
 0x984   :  { %v1670_v43 = vpop.f32.mrb[48].mxu1  ;;  %v1711_v44 = vpop.f32.mrb[48].mxu0 }
 0x985   :  { %v1718_v45 = vadd.f32 %v1670_v43, %v2601_v4  ;;  %v1720_v10 = vadd.f32 %v1711_v44, %v3017_v46  ;;  %v1672_v11 = vpop.f32.mrb[49].mxu1  ;;  %v1713_v47 = vpop.f32.mrb[49].mxu0 }
 0x986   :  { %v1719_v49 = vadd.f32 %v1672_v11, %v3018_v48  ;;  %v1721_v6 = vadd.f32 %v1713_v47, %v3019_v19  ;;  %v1674_v7 = vpop.f32.mrb[50].mxu1  ;;  %v1715_v61 = vpop.f32.mrb[50].mxu0 }
 0x987   :  { %v1857_v0 = vmul.f32 -1.442695, %v1718_v45  ;;  %v1675_v29 = vpop.f32.mrb[51].mxu1  ;;  %v1716_v23 = vpop.f32.mrb[51].mxu0  ;;  %v1859_v27 = vmul.f32 -1.442695, %v1720_v10 }
 0x988   :  { %v1858_v50 = vmul.f32 -1.442695, %v1719_v49 }
 0x989   :  { %2104 = vpow2.f32 %v1857_v0 }
 0x98a   :  { %2106 = vpow2.f32 %v1858_v50 }
 0x98b   :  { %2108 = vtanh.f32 %v1721_v6 }
 0x98c   :  { %2110 = vpow2.f32 %v1859_v27 }
 0x993   :  { %v2105_v28 = vpop.eup %2104 }
 0x994   :  { %v1731_v30 = vadd.f32 1.0, %v2105_v28  ;;  %v2107_v4 = vpop.eup %2106 }
 0x995   :  { %v1732_v31 = vadd.f32 1.0, %v2107_v4  ;;  %v2109_v32 = vpop.eup %2108 }
 0x996   :  { %2112 = vrcp.f32 %v1731_v30  ;;  %v2111_v33 = vpop.eup %2110 }
 0x997   :  { %2114 = vrcp.f32 %v1732_v31  ;;  %v1733_v62 = vadd.f32 1.0, %v2111_v33 }
 0x999   :  { %2116 = vrcp.f32 %v1733_v62 }
 0x9a0   :  { %v2113_v35 = vpop.eup %2112 }
 0x9a1   :  { %v1742_v36 = vmul.f32 %v2113_v35, %v2109_v32  ;;  %v2115_v56 = vpop.eup %2114 }
 0x9a2   :  { %v1741_v26 = vmul.f32 %v2115_v56, %v1627_v25 }
 0x9a3   :  { %v2117_v8 = vpop.eup %2116 }
 0x9a4   :  { %v1743_v2 = vadd.f32 %v1742_v36, %v1741_v26 }
 0x9a6   :  { %2118 = vtanh.f32 %v1743_v2 }
 0x9b0   :  { %v2119_v51 = vpop.eup %2118 }
 0x9b1   :  { %v1745_v40 = vmul.f32 %v2119_v51, %v2117_v8 }
 0x9b3   :  { %v1752_v54 = vsel %vm1751_vm10, %v1745_v40, %v1626_v41 }
 0x9b4   :  { %1753 = vst [vmem:[%s2982_s6] sm:$0xff] %v1752_v54 }
 0x9b5   :  { %1758 = vsyncpa [#allocation4], 1 }

</bundles_post_ra>
